<compile_context>
chip_gen: v7x
topology: tpu7x:2x2x1
jax: 0.10.0
libtpu: 0.0.40
codegen_flags: <defaults>
</compile_context>

<pallas_src>
import math
import functools

import jax
import jax.numpy as jnp
import numpy as np
from jax.experimental import pallas as pl
from jax.experimental.pallas import tpu as pltpu


# ----------------------------------------------------------------------------
# Pallas kernel: one (batch, row-tile) per grid step, everything fused.
# ----------------------------------------------------------------------------
def _mlp_kernel(xt_ref, xtop_ref, xbot_ref, w1_ref, b1_ref, dww_ref, dwb_ref,
                w2_ref, b2_ref, o_ref, *, TH, W, T):
    f32 = jnp.float32
    Chp = w1_ref.shape[1]            # padded hidden_features (multiple of 128)
    t = pl.program_id(1)             # row-tile index

    w1 = w1_ref[...]
    b1 = b1_ref[...]

    # ---- fc1 on the MXU (bf16 operands, f32 accumulation) -------------------
    h_tile = jnp.dot(xt_ref[0], w1, preferred_element_type=f32) + b1   # (TH*W, Chp)
    h_top = jnp.dot(xtop_ref[0], w1, preferred_element_type=f32) + b1  # (W, Chp)
    h_bot = jnp.dot(xbot_ref[0], w1, preferred_element_type=f32) + b1  # (W, Chp)

    # Halo rows outside the image act as the conv's zero padding.
    top_gate = (t > 0).astype(f32)
    bot_gate = (t < T - 1).astype(f32)
    h_top = h_top * top_gate
    h_bot = h_bot * bot_gate

    # (TH+2, W, Chp) slab: tile rows plus 1 halo row above and below.
    hp = jnp.concatenate([h_top.reshape(1, W, Chp),
                          h_tile.reshape(TH, W, Chp),
                          h_bot.reshape(1, W, Chp)], axis=0)

    # W-direction shifted copies, zero at the left / right image border.
    zcol = jnp.zeros((TH + 2, 1, Chp), f32)
    c_m1 = jnp.concatenate([zcol, hp[:, :W - 1, :]], axis=1)   # h[:, j-1]
    c_p1 = jnp.concatenate([hp[:, 1:, :], zcol], axis=1)       # h[:, j+1]

    # ---- depthwise 3x3 conv (VPU, f32) --------------------------------------
    taps = dww_ref[...]                                        # (3, 3, Chp), one load
    cols = (c_m1, hp, c_p1)                                    # index = kernel dw
    acc = None
    for dw in range(3):
        col = cols[dw]
        for dh in range(3):
            term = col[dh:dh + TH] * taps[dh:dh + 1, dw:dw + 1, :]
            acc = term if acc is None else acc + term
    acc = acc + dwb_ref[...].reshape(1, 1, Chp)                # conv bias

    h2 = acc.reshape(TH * W, Chp)

    # ---- exact GELU (nn.GELU default, erf form) -- f32 on VPU/EUP -----------
    inv_sqrt2 = jnp.float32(1.0 / math.sqrt(2.0))
    g = jnp.float32(0.5) * h2 * (jnp.float32(1.0)
                                 + jax.scipy.special.erf(h2 * inv_sqrt2))

    # dropout p = 0.0 -> identity
    # TODO(synk): training-mode dropout (p > 0) would need pltpu PRNG + mask.

    # ---- fc2 on the MXU ------------------------------------------------------
    out = jnp.dot(g.astype(w2_ref.dtype), w2_ref[...],
                  preferred_element_type=f32)
    out = out + b2_ref[...]                                    # (TH*W, Coutp)

    o_ref[0] = out.astype(o_ref.dtype)


def _round_up(x, m):
    return ((x + m - 1) // m) * m


def _pad_last(a, target):
    pad = target - a.shape[-1]
    if pad == 0:
        return a
    return jnp.pad(a, [(0, 0)] * (a.ndim - 1) + [(0, pad)])


def mlp_pallas(x, params, H, W, *, row_tile=None, use_bf16=True):
    """x: (B, N, Cin) with N == H*W.  Returns (B, N, Cout)."""
    B, N, Cin = x.shape
    assert N == H * W
    # TODO(synk): W % 8 != 0 feature maps would need a flattened pltpu.roll +
    # boundary-mask conv path instead of the (rows, W, C) reshape.
    assert W % 8 == 0, "W must be a multiple of 8 (sublane tile)"

    if row_tile is None:
        row_tile = 8 if (H % 8 == 0 and H > 8) else H
    assert H % row_tile == 0
    TH = row_tile
    T = H // TH

    w1, b1, dww, dwb, w2, b2 = (params["w1"], params["b1"], params["dw_w"],
                                params["dw_b"], params["w2"], params["b2"])
    Ch = w1.shape[1]
    Cout = w2.shape[1]

    # Pad channel dims to multiples of 128 (lane-dense matmuls / stores).
    Chp = _round_up(Ch, 128)
    Coutp = _round_up(Cout, 128)
    w1p = _pad_last(w1, Chp)                                   # (Cin, Chp)
    b1p = _pad_last(b1, Chp)                                   # (1, Chp)
    dwwp = _pad_last(dww, Chp)                                 # (3, 3, Chp)
    dwbp = _pad_last(dwb, Chp)                                 # (1, Chp)
    w2p = jnp.pad(w2, ((0, Chp - Ch), (0, Coutp - Cout)))      # (Chp, Coutp)
    b2p = _pad_last(b2, Coutp)                                 # (1, Coutp)

    out_dtype = x.dtype
    mxu_dtype = jnp.bfloat16 if use_bf16 else x.dtype
    x_in = x.astype(mxu_dtype)
    w1p = w1p.astype(mxu_dtype)
    w2p = w2p.astype(mxu_dtype)

    kernel = functools.partial(_mlp_kernel, TH=TH, W=W, T=T)

    itemsize_in = jnp.dtype(mxu_dtype).itemsize
    flops = int(B * N * (2 * Cin * Chp + 2 * Chp * Coutp + 20 * Chp))
    transcendentals = int(B * N * Chp)
    bytes_accessed = int(
        B * N * Cin * itemsize_in
        + (w1p.size + w2p.size) * itemsize_in
        + (b1p.size + dwwp.size + dwbp.size + b2p.size) * 4
        + B * N * Coutp * jnp.dtype(out_dtype).itemsize)

    out = pl.pallas_call(
        kernel,
        out_shape=jax.ShapeDtypeStruct((B, N, Coutp), out_dtype),
        grid_spec=pltpu.PrefetchScalarGridSpec(
            num_scalar_prefetch=0,
            grid=(B, T),
            in_specs=[
                # row tile of x: image rows [t*TH, (t+1)*TH)
                pl.BlockSpec((1, TH * W, Cin), lambda b, t: (b, t, 0)),
                # 1-row halo above (clamped; zeroed in-kernel when t == 0)
                pl.BlockSpec((1, W, Cin),
                             lambda b, t: (b, jnp.maximum(t * TH - 1, 0), 0)),
                # 1-row halo below (clamped; zeroed in-kernel when t == T-1)
                pl.BlockSpec((1, W, Cin),
                             lambda b, t: (b, jnp.minimum(t * TH + TH, H - 1), 0)),
                pl.BlockSpec((Cin, Chp), lambda b, t: (0, 0)),       # fc1 weight
                pl.BlockSpec((1, Chp), lambda b, t: (0, 0)),         # fc1 bias
                pl.BlockSpec((3, 3, Chp), lambda b, t: (0, 0, 0)),   # dwconv weight
                pl.BlockSpec((1, Chp), lambda b, t: (0, 0)),         # dwconv bias
                pl.BlockSpec((Chp, Coutp), lambda b, t: (0, 0)),     # fc2 weight
                pl.BlockSpec((1, Coutp), lambda b, t: (0, 0)),       # fc2 bias
            ],
            out_specs=pl.BlockSpec((1, TH * W, Coutp), lambda b, t: (b, t, 0)),
        ),
        compiler_params=pltpu.CompilerParams(
            dimension_semantics=("parallel", "parallel"),
            vmem_limit_bytes=32 * 1024 * 1024),
        cost_estimate=pl.CostEstimate(flops=flops,
                                      transcendentals=transcendentals,
                                      bytes_accessed=bytes_accessed),
    )(x_in, x_in, x_in, w1p, b1p, dwwp, dwbp, w2p, b2p)

    return out[..., :Cout]


# ----------------------------------------------------------------------------
# Pure-JAX reference (f32, same math) for the correctness check.
# ----------------------------------------------------------------------------
def mlp_ref(x, params, H, W):
    w1, b1, dww, dwb, w2, b2 = (params["w1"], params["b1"], params["dw_w"],
                                params["dw_b"], params["w2"], params["b2"])
    B, N, _ = x.shape
    Ch = w1.shape[1]
    h = x @ w1 + b1                                  # (B, N, Ch)
    himg = h.reshape(B, H, W, Ch)
    himg_p = jnp.pad(himg, ((0, 0), (1, 1), (1, 1), (0, 0)))
    acc = jnp.zeros_like(himg)
    for dh in range(3):
        for dw in range(3):
            acc = acc + himg_p[:, dh:dh + H, dw:dw + W, :] * dww[dh, dw]
    acc = acc + dwb.reshape(1, 1, 1, Ch)
    h2 = acc.reshape(B, N, Ch)
    g = 0.5 * h2 * (1.0 + jax.scipy.special.erf(h2 / jnp.sqrt(2.0)))
    return g @ w2 + b2


# ----------------------------------------------------------------------------
# Deterministic parameter init (matches module's __init__ shapes).
# ----------------------------------------------------------------------------
def init_params(key, in_features, hidden_features, out_features):
    k1, k2, k3 = jax.random.split(key, 3)
    w1 = (0.02 * jax.random.truncated_normal(
        k1, -2.0, 2.0, (in_features, hidden_features))).astype(jnp.float32)
    b1 = jnp.zeros((1, hidden_features), jnp.float32)
    # depthwise conv: PyTorch weight (hidden, 1, 3, 3) stored as (3, 3, hidden)
    fan_out = 3 * 3 * hidden_features // hidden_features  # == 9 (groups == dim)
    dw_w = (math.sqrt(2.0 / fan_out) * jax.random.normal(
        k2, (3, 3, hidden_features))).astype(jnp.float32)
    dw_b = jnp.zeros((1, hidden_features), jnp.float32)
    w2 = (0.02 * jax.random.truncated_normal(
        k3, -2.0, 2.0, (hidden_features, out_features))).astype(jnp.float32)
    b2 = jnp.zeros((1, out_features), jnp.float32)
    return {"w1": w1, "b1": b1, "dw_w": dw_w, "dw_b": dw_b,
            "w2": w2, "b2": b2}


if __name__ == "__main__":
    B, H, W = 2, 16, 16
    N = H * W
    in_features, hidden_features, out_features = 32, 64, 32

    key = jax.random.PRNGKey(0)
    kx, kp = jax.random.split(key)
    x = jax.random.normal(kx, (B, N, in_features), dtype=jnp.float32)
    params = init_params(kp, in_features, hidden_features, out_features)

    out = mlp_pallas(x, params, H, W, row_tile=8, use_bf16=True)
    out = jax.block_until_ready(out)

    ref = mlp_ref(x, params, H, W)
    # bf16 MXU operands (f32 accumulation) -> relaxed tolerance vs f32 reference
    np.testing.assert_allclose(np.asarray(out), np.asarray(ref),
                               atol=3e-3, rtol=3e-2)

    print("KERNEL_OK")
</pallas_src>

<mosaic_0001>
module attributes {stable_mosaic.version = 11 : i64} {
  func.func @_mlp_kernel(%arg0: i32, %arg1: i32, %arg2: memref<1x128x32xbf16, #tpu.memory_space<vmem>>, %arg3: memref<1x16x32xbf16, #tpu.memory_space<vmem>>, %arg4: memref<1x16x32xbf16, #tpu.memory_space<vmem>>, %arg5: memref<32x128xbf16, #tpu.memory_space<vmem>>, %arg6: memref<1x128xf32, #tpu.memory_space<vmem>>, %arg7: memref<3x3x128xf32, #tpu.memory_space<vmem>>, %arg8: memref<1x128xf32, #tpu.memory_space<vmem>>, %arg9: memref<128x128xbf16, #tpu.memory_space<vmem>>, %arg10: memref<1x128xf32, #tpu.memory_space<vmem>>, %arg11: memref<1x128x128xf32, #tpu.memory_space<vmem>>) attributes {dimension_semantics = [#tpu.dimension_semantics<parallel>, #tpu.dimension_semantics<parallel>], iteration_bounds = array<i64: 2, 2>, scalar_prefetch = 0 : i64, scratch_operands = 0 : i64, tpu.core_type = #tpu.core_type<tc>, window_params = [{transform_indices = @transform_0, window_bounds = array<i64: 1, 128, 32>}, {transform_indices = @transform_1, window_bounds = array<i64: 1, 16, 32>}, {transform_indices = @transform_2, window_bounds = array<i64: 1, 16, 32>}, {pipeline_mode = #tpu.pipeline_mode<synchronous>, transform_indices = @transform_3, window_bounds = array<i64: 32, 128>}, {pipeline_mode = #tpu.pipeline_mode<synchronous>, transform_indices = @transform_4, window_bounds = array<i64: 1, 128>}, {pipeline_mode = #tpu.pipeline_mode<synchronous>, transform_indices = @transform_5, window_bounds = array<i64: 3, 3, 128>}, {pipeline_mode = #tpu.pipeline_mode<synchronous>, transform_indices = @transform_6, window_bounds = array<i64: 1, 128>}, {pipeline_mode = #tpu.pipeline_mode<synchronous>, transform_indices = @transform_7, window_bounds = array<i64: 128, 128>}, {pipeline_mode = #tpu.pipeline_mode<synchronous>, transform_indices = @transform_8, window_bounds = array<i64: 1, 128>}, {transform_indices = @transform_9, window_bounds = array<i64: 1, 128, 128>}]} {
    %c0 = arith.constant 0 : index
    %c0_0 = arith.constant 0 : index
    %0 = vector.load %arg5[%c0, %c0_0] : memref<32x128xbf16, #tpu.memory_space<vmem>>, vector<32x128xbf16>
    %c0_1 = arith.constant 0 : index
    %c0_2 = arith.constant 0 : index
    %1 = vector.load %arg6[%c0_1, %c0_2] : memref<1x128xf32, #tpu.memory_space<vmem>>, vector<1x128xf32>
    %c0_3 = arith.constant 0 : index
    %c0_4 = arith.constant 0 : index
    %c0_5 = arith.constant 0 : index
    %2 = vector.load %arg2[%c0_3, %c0_4, %c0_5] : memref<1x128x32xbf16, #tpu.memory_space<vmem>>, vector<1x128x32xbf16>
    %3 = vector.shape_cast %2 : vector<1x128x32xbf16> to vector<128x32xbf16>
    %cst = arith.constant dense<0.000000e+00> : vector<128x128xf32>
    %4 = tpu.matmul %3, %0, %cst {dimension_numbers = #tpu.dot_dimension_numbers<[1], [0], [0], [1], [0, 0, 1, 1], [], []>} : vector<128x32xbf16>, vector<32x128xbf16>, vector<128x128xf32> -> vector<128x128xf32>
    %5 = vector.broadcast %1 : vector<1x128xf32> to vector<128x128xf32>
    %6 = arith.addf %4, %5 : vector<128x128xf32>
    %c0_6 = arith.constant 0 : index
    %c0_7 = arith.constant 0 : index
    %c0_8 = arith.constant 0 : index
    %7 = vector.load %arg3[%c0_6, %c0_7, %c0_8] : memref<1x16x32xbf16, #tpu.memory_space<vmem>>, vector<1x16x32xbf16>
    %8 = vector.shape_cast %7 : vector<1x16x32xbf16> to vector<16x32xbf16>
    %cst_9 = arith.constant dense<0.000000e+00> : vector<16x128xf32>
    %9 = tpu.matmul %8, %0, %cst_9 {dimension_numbers = #tpu.dot_dimension_numbers<[1], [0], [0], [1], [0, 0, 1, 1], [], []>} : vector<16x32xbf16>, vector<32x128xbf16>, vector<16x128xf32> -> vector<16x128xf32>
    %10 = vector.broadcast %1 : vector<1x128xf32> to vector<16x128xf32>
    %11 = arith.addf %9, %10 : vector<16x128xf32>
    %c0_10 = arith.constant 0 : index
    %c0_11 = arith.constant 0 : index
    %c0_12 = arith.constant 0 : index
    %12 = vector.load %arg4[%c0_10, %c0_11, %c0_12] : memref<1x16x32xbf16, #tpu.memory_space<vmem>>, vector<1x16x32xbf16>
    %13 = vector.shape_cast %12 : vector<1x16x32xbf16> to vector<16x32xbf16>
    %cst_13 = arith.constant dense<0.000000e+00> : vector<16x128xf32>
    %14 = tpu.matmul %13, %0, %cst_13 {dimension_numbers = #tpu.dot_dimension_numbers<[1], [0], [0], [1], [0, 0, 1, 1], [], []>} : vector<16x32xbf16>, vector<32x128xbf16>, vector<16x128xf32> -> vector<16x128xf32>
    %15 = vector.broadcast %1 : vector<1x128xf32> to vector<16x128xf32>
    %16 = arith.addf %14, %15 : vector<16x128xf32>
    %c0_i32 = arith.constant 0 : i32
    %17 = arith.cmpi sgt, %arg1, %c0_i32 : i32
    %18 = arith.extui %17 : i1 to i32
    %19 = arith.sitofp %18 : i32 to f32
    %c1_i32 = arith.constant 1 : i32
    %20 = arith.cmpi slt, %arg1, %c1_i32 : i32
    %21 = arith.extui %20 : i1 to i32
    %22 = arith.sitofp %21 : i32 to f32
    %23 = vector.broadcast %19 : f32 to vector<16x128xf32>
    %24 = arith.mulf %11, %23 : vector<16x128xf32>
    %25 = vector.broadcast %22 : f32 to vector<16x128xf32>
    %26 = arith.mulf %16, %25 : vector<16x128xf32>
    %27 = vector.shape_cast %24 : vector<16x128xf32> to vector<1x16x128xf32>
    %28 = vector.shape_cast %6 : vector<128x128xf32> to vector<8x16x128xf32>
    %29 = vector.shape_cast %26 : vector<16x128xf32> to vector<1x16x128xf32>
    %30 = tpu.concatenate %27, %28, %29 in 0 : vector<1x16x128xf32>, vector<8x16x128xf32>, vector<1x16x128xf32> -> vector<10x16x128xf32>
    %cst_14 = arith.constant 0.000000e+00 : f32
    %31 = vector.broadcast %cst_14 : f32 to vector<10x1x128xf32>
    %32 = vector.extract_strided_slice %30 {offsets = [0, 0, 0], sizes = [10, 15, 128], strides = [1, 1, 1]} : vector<10x16x128xf32> to vector<10x15x128xf32>
    %33 = tpu.concatenate %31, %32 in 1 : vector<10x1x128xf32>, vector<10x15x128xf32> -> vector<10x16x128xf32>
    %34 = vector.extract_strided_slice %30 {offsets = [0, 1, 0], sizes = [10, 15, 128], strides = [1, 1, 1]} : vector<10x16x128xf32> to vector<10x15x128xf32>
    %35 = tpu.concatenate %34, %31 in 1 : vector<10x15x128xf32>, vector<10x1x128xf32> -> vector<10x16x128xf32>
    %c0_15 = arith.constant 0 : index
    %c0_16 = arith.constant 0 : index
    %c0_17 = arith.constant 0 : index
    %36 = vector.load %arg7[%c0_15, %c0_16, %c0_17] : memref<3x3x128xf32, #tpu.memory_space<vmem>>, vector<3x3x128xf32>
    %37 = vector.extract_strided_slice %33 {offsets = [0, 0, 0], sizes = [8, 16, 128], strides = [1, 1, 1]} : vector<10x16x128xf32> to vector<8x16x128xf32>
    %38 = vector.extract_strided_slice %36 {offsets = [0, 0, 0], sizes = [1, 1, 128], strides = [1, 1, 1]} : vector<3x3x128xf32> to vector<1x1x128xf32>
    %39 = vector.broadcast %38 : vector<1x1x128xf32> to vector<8x16x128xf32>
    %40 = arith.mulf %37, %39 : vector<8x16x128xf32>
    %41 = vector.extract_strided_slice %33 {offsets = [1, 0, 0], sizes = [8, 16, 128], strides = [1, 1, 1]} : vector<10x16x128xf32> to vector<8x16x128xf32>
    %42 = vector.extract_strided_slice %36 {offsets = [1, 0, 0], sizes = [1, 1, 128], strides = [1, 1, 1]} : vector<3x3x128xf32> to vector<1x1x128xf32>
    %43 = vector.broadcast %42 : vector<1x1x128xf32> to vector<8x16x128xf32>
    %44 = arith.mulf %41, %43 : vector<8x16x128xf32>
    %45 = arith.addf %40, %44 : vector<8x16x128xf32>
    %46 = vector.extract_strided_slice %33 {offsets = [2, 0, 0], sizes = [8, 16, 128], strides = [1, 1, 1]} : vector<10x16x128xf32> to vector<8x16x128xf32>
    %47 = vector.extract_strided_slice %36 {offsets = [2, 0, 0], sizes = [1, 1, 128], strides = [1, 1, 1]} : vector<3x3x128xf32> to vector<1x1x128xf32>
    %48 = vector.broadcast %47 : vector<1x1x128xf32> to vector<8x16x128xf32>
    %49 = arith.mulf %46, %48 : vector<8x16x128xf32>
    %50 = arith.addf %45, %49 : vector<8x16x128xf32>
    %51 = vector.extract_strided_slice %30 {offsets = [0, 0, 0], sizes = [8, 16, 128], strides = [1, 1, 1]} : vector<10x16x128xf32> to vector<8x16x128xf32>
    %52 = vector.extract_strided_slice %36 {offsets = [0, 1, 0], sizes = [1, 1, 128], strides = [1, 1, 1]} : vector<3x3x128xf32> to vector<1x1x128xf32>
    %53 = vector.broadcast %52 : vector<1x1x128xf32> to vector<8x16x128xf32>
    %54 = arith.mulf %51, %53 : vector<8x16x128xf32>
    %55 = arith.addf %50, %54 : vector<8x16x128xf32>
    %56 = vector.extract_strided_slice %30 {offsets = [1, 0, 0], sizes = [8, 16, 128], strides = [1, 1, 1]} : vector<10x16x128xf32> to vector<8x16x128xf32>
    %57 = vector.extract_strided_slice %36 {offsets = [1, 1, 0], sizes = [1, 1, 128], strides = [1, 1, 1]} : vector<3x3x128xf32> to vector<1x1x128xf32>
    %58 = vector.broadcast %57 : vector<1x1x128xf32> to vector<8x16x128xf32>
    %59 = arith.mulf %56, %58 : vector<8x16x128xf32>
    %60 = arith.addf %55, %59 : vector<8x16x128xf32>
    %61 = vector.extract_strided_slice %30 {offsets = [2, 0, 0], sizes = [8, 16, 128], strides = [1, 1, 1]} : vector<10x16x128xf32> to vector<8x16x128xf32>
    %62 = vector.extract_strided_slice %36 {offsets = [2, 1, 0], sizes = [1, 1, 128], strides = [1, 1, 1]} : vector<3x3x128xf32> to vector<1x1x128xf32>
    %63 = vector.broadcast %62 : vector<1x1x128xf32> to vector<8x16x128xf32>
    %64 = arith.mulf %61, %63 : vector<8x16x128xf32>
    %65 = arith.addf %60, %64 : vector<8x16x128xf32>
    %66 = vector.extract_strided_slice %35 {offsets = [0, 0, 0], sizes = [8, 16, 128], strides = [1, 1, 1]} : vector<10x16x128xf32> to vector<8x16x128xf32>
    %67 = vector.extract_strided_slice %36 {offsets = [0, 2, 0], sizes = [1, 1, 128], strides = [1, 1, 1]} : vector<3x3x128xf32> to vector<1x1x128xf32>
    %68 = vector.broadcast %67 : vector<1x1x128xf32> to vector<8x16x128xf32>
    %69 = arith.mulf %66, %68 : vector<8x16x128xf32>
    %70 = arith.addf %65, %69 : vector<8x16x128xf32>
    %71 = vector.extract_strided_slice %35 {offsets = [1, 0, 0], sizes = [8, 16, 128], strides = [1, 1, 1]} : vector<10x16x128xf32> to vector<8x16x128xf32>
    %72 = vector.extract_strided_slice %36 {offsets = [1, 2, 0], sizes = [1, 1, 128], strides = [1, 1, 1]} : vector<3x3x128xf32> to vector<1x1x128xf32>
    %73 = vector.broadcast %72 : vector<1x1x128xf32> to vector<8x16x128xf32>
    %74 = arith.mulf %71, %73 : vector<8x16x128xf32>
    %75 = arith.addf %70, %74 : vector<8x16x128xf32>
    %76 = vector.extract_strided_slice %35 {offsets = [2, 0, 0], sizes = [8, 16, 128], strides = [1, 1, 1]} : vector<10x16x128xf32> to vector<8x16x128xf32>
    %77 = vector.extract_strided_slice %36 {offsets = [2, 2, 0], sizes = [1, 1, 128], strides = [1, 1, 1]} : vector<3x3x128xf32> to vector<1x1x128xf32>
    %78 = vector.broadcast %77 : vector<1x1x128xf32> to vector<8x16x128xf32>
    %79 = arith.mulf %76, %78 : vector<8x16x128xf32>
    %80 = arith.addf %75, %79 : vector<8x16x128xf32>
    %c0_18 = arith.constant 0 : index
    %c0_19 = arith.constant 0 : index
    %81 = vector.load %arg8[%c0_18, %c0_19] : memref<1x128xf32, #tpu.memory_space<vmem>>, vector<1x128xf32>
    %82 = vector.shape_cast %81 : vector<1x128xf32> to vector<1x1x128xf32>
    %83 = vector.broadcast %82 : vector<1x1x128xf32> to vector<8x16x128xf32>
    %84 = arith.addf %80, %83 : vector<8x16x128xf32>
    %85 = vector.shape_cast %84 : vector<8x16x128xf32> to vector<128x128xf32>
    %cst_20 = arith.constant 5.000000e-01 : f32
    %86 = vector.broadcast %cst_20 : f32 to vector<128x128xf32>
    %87 = arith.mulf %86, %85 : vector<128x128xf32>
    %cst_21 = arith.constant 0.707106769 : f32
    %88 = vector.broadcast %cst_21 : f32 to vector<128x128xf32>
    %89 = arith.mulf %85, %88 : vector<128x128xf32>
    %90 = math.erf %89 : vector<128x128xf32>
    %cst_22 = arith.constant 1.000000e+00 : f32
    %91 = vector.broadcast %cst_22 : f32 to vector<128x128xf32>
    %92 = arith.addf %91, %90 : vector<128x128xf32>
    %93 = arith.mulf %87, %92 : vector<128x128xf32>
    %94 = arith.truncf %93 : vector<128x128xf32> to vector<128x128xbf16>
    %c0_23 = arith.constant 0 : index
    %c0_24 = arith.constant 0 : index
    %95 = vector.load %arg9[%c0_23, %c0_24] : memref<128x128xbf16, #tpu.memory_space<vmem>>, vector<128x128xbf16>
    %cst_25 = arith.constant dense<0.000000e+00> : vector<128x128xf32>
    %96 = tpu.matmul %94, %95, %cst_25 {dimension_numbers = #tpu.dot_dimension_numbers<[1], [0], [0], [1], [0, 0, 1, 1], [], []>} : vector<128x128xbf16>, vector<128x128xbf16>, vector<128x128xf32> -> vector<128x128xf32>
    %c0_26 = arith.constant 0 : index
    %c0_27 = arith.constant 0 : index
    %97 = vector.load %arg10[%c0_26, %c0_27] : memref<1x128xf32, #tpu.memory_space<vmem>>, vector<1x128xf32>
    %98 = vector.broadcast %97 : vector<1x128xf32> to vector<128x128xf32>
    %99 = arith.addf %96, %98 : vector<128x128xf32>
    %c0_28 = arith.constant 0 : index
    %c0_29 = arith.constant 0 : index
    %c0_30 = arith.constant 0 : index
    %100 = vector.load %arg11[%c0_28, %c0_29, %c0_30] : memref<1x128x128xf32, #tpu.memory_space<vmem>>, vector<1x128x128xf32>
    %101 = vector.shape_cast %100 : vector<1x128x128xf32> to vector<128x128xf32>
    %102 = vector.shape_cast %99 : vector<128x128xf32> to vector<1x128x128xf32>
    tpu.vector_store %arg11[%c0_28, %c0_29, %c0_30], %102 {strides = array<i32>} : memref<1x128x128xf32, #tpu.memory_space<vmem>>, vector<1x128x128xf32>,
    return
  }
  func.func @transform_0(%arg0: i32, %arg1: i32) -> (i32, i32, i32) {
    %c0_i32 = arith.constant 0 : i32
    %c0_i32_0 = arith.constant 0 : i32
    return %arg0, %arg1, %c0_i32 : i32, i32, i32
  }
  func.func @transform_1(%arg0: i32, %arg1: i32) -> (i32, i32, i32) {
    %c8_i32 = arith.constant 8 : i32
    %0 = arith.muli %arg1, %c8_i32 : i32
    %c1_i32 = arith.constant 1 : i32
    %1 = arith.subi %0, %c1_i32 : i32
    %c0_i32 = arith.constant 0 : i32
    %2 = arith.maxsi %1, %c0_i32 : i32
    %c0_i32_0 = arith.constant 0 : i32
    %c0_i32_1 = arith.constant 0 : i32
    return %arg0, %2, %c0_i32_0 : i32, i32, i32
  }
  func.func @transform_2(%arg0: i32, %arg1: i32) -> (i32, i32, i32) {
    %c8_i32 = arith.constant 8 : i32
    %0 = arith.muli %arg1, %c8_i32 : i32
    %c8_i32_0 = arith.constant 8 : i32
    %1 = arith.addi %0, %c8_i32_0 : i32
    %c15_i32 = arith.constant 15 : i32
    %2 = arith.minsi %1, %c15_i32 : i32
    %c0_i32 = arith.constant 0 : i32
    %c0_i32_1 = arith.constant 0 : i32
    return %arg0, %2, %c0_i32 : i32, i32, i32
  }
  func.func @transform_3(%arg0: i32, %arg1: i32) -> (i32, i32) {
    %c0_i32 = arith.constant 0 : i32
    %c0_i32_0 = arith.constant 0 : i32
    %c0_i32_1 = arith.constant 0 : i32
    return %c0_i32, %c0_i32_0 : i32, i32
  }
  func.func @transform_4(%arg0: i32, %arg1: i32) -> (i32, i32) {
    %c0_i32 = arith.constant 0 : i32
    %c0_i32_0 = arith.constant 0 : i32
    %c0_i32_1 = arith.constant 0 : i32
    return %c0_i32, %c0_i32_0 : i32, i32
  }
  func.func @transform_5(%arg0: i32, %arg1: i32) -> (i32, i32, i32) {
    %c0_i32 = arith.constant 0 : i32
    %c0_i32_0 = arith.constant 0 : i32
    %c0_i32_1 = arith.constant 0 : i32
    %c0_i32_2 = arith.constant 0 : i32
    return %c0_i32, %c0_i32_0, %c0_i32_1 : i32, i32, i32
  }
  func.func @transform_6(%arg0: i32, %arg1: i32) -> (i32, i32) {
    %c0_i32 = arith.constant 0 : i32
    %c0_i32_0 = arith.constant 0 : i32
    %c0_i32_1 = arith.constant 0 : i32
    return %c0_i32, %c0_i32_0 : i32, i32
  }
  func.func @transform_7(%arg0: i32, %arg1: i32) -> (i32, i32) {
    %c0_i32 = arith.constant 0 : i32
    %c0_i32_0 = arith.constant 0 : i32
    %c0_i32_1 = arith.constant 0 : i32
    return %c0_i32, %c0_i32_0 : i32, i32
  }
  func.func @transform_8(%arg0: i32, %arg1: i32) -> (i32, i32) {
    %c0_i32 = arith.constant 0 : i32
    %c0_i32_0 = arith.constant 0 : i32
    %c0_i32_1 = arith.constant 0 : i32
    return %c0_i32, %c0_i32_0 : i32, i32
  }
  func.func @transform_9(%arg0: i32, %arg1: i32) -> (i32, i32, i32) {
    %c0_i32 = arith.constant 0 : i32
    %c0_i32_0 = arith.constant 0 : i32
    return %arg0, %arg1, %c0_i32 : i32, i32, i32
  }
}

</mosaic_0001>

<bundles_post_ra>
// kernel: tpu_custom_call.1
= control target key start
LH: loop header
LB: loop body
LE: loop exit
PB: predicated region body
PF: predicated region fallthrough
CT: control target
= control target key end

     0   :  { %s3037_s0 = inlined_call_operand.vmem [shape: bf16[2,256,32], index: 0, kind: input, shape index: {}]   ;;  %s3038_s1 = inlined_call_operand.vmem [shape: bf16[2,256,32], index: 1, kind: input, shape index: {}]   ;;  %s3039_s2 = inlined_call_operand.vmem [shape: bf16[2,256,32], index: 2, kind: input, shape index: {}]   ;;  %s3040_s3 = inlined_call_operand.vmem [shape: bf16[32,128], index: 3, kind: input, shape index: {}]   ;;  %s3041_s4 = inlined_call_operand.vmem [shape: f32[1,128], index: 4, kind: input, shape index: {}]   ;;  %s3042_s5 = inlined_call_operand.vmem [shape: f32[3,3,128], index: 5, kind: input, shape index: {}]   ;;  %s3043_s6 = inlined_call_operand.vmem [shape: f32[1,128], index: 6, kind: input, shape index: {}]   ;;  %s3044_s7 = inlined_call_operand.vmem [shape: bf16[128,128], index: 7, kind: input, shape index: {}]   ;;  %s3045_s8 = inlined_call_operand.vmem [shape: f32[1,128], index: 8, kind: input, shape index: {}]   ;;  %s3046_s9 = inlined_call_operand.hbm [shape: f32[2,256,128], index: 9, kind: output, shape index: {}]  }
   0x1   :  { %3074 = sst [smem:[#allocation38_spill]] %s3037_s0 }
   0x2   :  { %3075 = sst [smem:[#allocation39_spill]] %s3040_s3 }
   0x3   :  { %14 = vsyncpa [#allocation3], 0 }
   0x4   :  { %16 = vsyncpa [#allocation3 + $0x1], 0  ;;  %s2129_s30 = smov 0   ;;  %s2131_s10 = smov 0  }
   0x5   :  { %s2133_s11 = smov 0   ;;  %s2135_s12 = smov 0  }
   0x6   :  { %s2137_s13 = smov 0   ;;  %s2139_s14 = smov 0  }
   0x7   :  { %s2141_s15 = smov 0   ;;  %s2143_s16 = smov 0  }
   0x8 LB: > { %3076 = sst [smem:[#allocation5_spill]] %s2064_s14  ;;  %s1688_s17 = sadd.s32 4294967295, %s2072_s16   ;;  %s2072_s16 = sphi %s2143_s16, %s22_s16   ;;  %s2068_s15 = sphi %s2141_s15, %s3161_s15   ;;  %s2064_s14 = sphi %s2139_s14, %s3160_s14   ;;  %s2060_s13 = sphi %s2137_s13, %s3159_s13   ;;  %s2056_s12 = sphi %s2135_s12, %s3158_s12   ;;  %s2052_s11 = sphi %s2133_s11, %s3164_s11   ;;  %s2048_s10 = sphi %s2131_s10, %s3163_s10   ;;  %s2044_s30 = sphi %s2129_s30, %s3162_s30  }
   0x9   : > { %3077 = sst [smem:[#allocation6_spill]] %s2068_s15  ;;  %s1689_s18 = sadd.s32 4294967294, %s2072_s16  }
   0xa   : > { %s31_s19 = sadd.s32 1, %s2064_s14  ;;  %s34_s20 = sadd.s32 1, %s2068_s15 }
   0xb   : > { %p32_p0 = scmp.ge.s32.totalorder %s31_s19, 2  ;;  %p279_p1 = scmp.ne.s32.totalorder %s2052_s11, %s2048_s10 }
   0xc   : > { %p280_p2 = scmp.eq.s32.totalorder %s1688_s17, 3  ;;  %p285_p5 = scmp.ne.s32.totalorder %s2048_s10, %s2044_s30 }
   0xd   : > { %s3166_s19 = smov (%p32_p0, %s31_s19), 0  ;;  %s3168_s20 = smov (!%p32_p0, %s34_s20), %s2068_s15 }
   0xe   : > { %3078 = sst [smem:[#allocation7_spill]] %s3166_s19  ;;  %s265_s21 = ssub.s32 %s2064_s14, %s3166_s19 }
   0xf   : > { %p2180_p3 = por %p280_p2, %p279_p1  ;;  %p36_p4 = scmp.ge.s32.totalorder %s3168_s20, 2 }
  0x10   : > { %p286_p6 = scmp.eq.s32.totalorder %s1689_s18, 3  ;;  %p1698_p7 = scmp.ge.s32.totalorder %s2072_s16, 1 }
  0x11   : > { %s3170_s20 = smov (%p36_p4, %s3168_s20), 0  ;;  %p377_p9 = scmp.lt.s32.totalorder %s2072_s16, 5 }
  0x12   : > { %3080 = sst [smem:[#allocation8_spill]] %s3170_s20  ;;  %p2189_p8 = por %p286_p6, %p285_p5 }
  0x13   : > { %s264_s24 = ssub.s32 %s2068_s15, %s3170_s20  ;;  %s269_s25 = sadd.s32 1, %s2052_s11 }
  0x14   : > { %s266_s26 = sor.u32 %s265_s21, %s264_s24  ;;  %p378_p10 = pnand %p1698_p7, %p377_p9 }
  0x15   : > { %p267_p11 = scmp.eq.s32.totalorder %s266_s26, 0 }
  0x16   : > { %381 = sbr.rel (%p378_p10) target bundleno = 626 (0x272), region = 56 }
  0x17   : > { %s2198_s27 = scalar_select %p267_p11, %s2052_s11, %s269_s25  }
  0x19   : > { %3082 = sst [smem:[#allocation9_spill]] %s2198_s27 }
  0x1d   : > { %s3083_s3 = sld [smem:[#allocation39_spill]]  ;;  %s2204_s17 = sshll.u32 %s2056_s12, 4  ;;  %vm570_vm0 = vcmask 261120   ;;  %v2074_v2 = vmov 0.0   ;;  %vm2075_vm1 = vmmov 0   ;;  %v1938_v13 = vld [vmem:[%s3044_s7] sm:$0xff]   ;;  %v951_v21 = vlaneseq }
  0x1e   : > { %p444_p12 = scmp.lt.s32.totalorder %s2060_s13, 1  ;;  %p446_p13 = scmp.lt.s32.totalorder %s2204_s17, 31  ;;  %v1939_v14 = vld [vmem:[%s3044_s7 + $0x8] sm:$0xff]   ;;  %1819 = vmatprep.subr.bf16.mxu0 %v1938_v13  ;;  %v1940_v15 = vld [vmem:[%s3044_s7 + $0x10] sm:$0xff]   ;;  %v1941_v16 = vld [vmem:[%s3044_s7 + $0x18] sm:$0xff]   ;;  %vm826_vm2 = vcmask 1040384  }
  0x1f   : > { %s3084_s0 = sld [smem:[#allocation38_spill]]  ;;  %s1703_s18 = sshll.u32 %s2056_s12, 3  ;;  %1820 = vmatpush3.bf16.msra.mxu0 %v1938_v13  ;;  %v1942_v17 = vld [vmem:[%s3044_s7 + $0x20] sm:$0xff]   ;;  %v1943_v18 = vld [vmem:[%s3044_s7 + $0x28] sm:$0xff]   ;;  %v1944_v19 = vld [vmem:[%s3044_s7 + $0x30] sm:$0xff]   ;;  %v952_v22 = vshrl.u32 %v951_v21, 7 }
  0x20   : > { %s445_s21 = scalar_select %p444_p12, %s2060_s13, 1  ;;  %1821 = vmatprep.subr.bf16.mxu0 %v1939_v14  ;;  %v1945_v20 = vld [vmem:[%s3044_s7 + $0x38] sm:$0xff]   ;;  %v948_v24 = vld [vmem:[%s3042_s5] sm:$0x7]  ;;  %v949_v25 = vld [vmem:[%s3042_s5 + $0x4] sm:$0x7] }
  0x21   : > { %s447_s24 = scalar_select %p446_p13, %s2204_s17, 31  ;;  %v1045_v23 = vsub.s32 1, %v952_v22  ;;  %v953_v26 = vsub.s32 0, %v952_v22  ;;  %v2287_v27 = vld [vmem:[%s3041_s4] ss:$0 sm:$0xff]  ;;  %v1153_v29 = vsub.s32 2, %v952_v22 }
  0x22   : > { %s2213_s25 = sshll.u32 %s445_s21, 5  ;;  %s1704_s21 = sadd.s32 4294967295, %s1703_s18  ;;  %v950_v28 = vld [vmem:[%s3042_s5 + $0x8] sm:$0x7]  ;;  %vm887_vm3 = vcmask 1046528  }
  0x23   : > { %v1926_v0 = vld [vmem:[%s3083_s3] sm:$0xff]   ;;  %v1927_v1 = vld [vmem:[%s3083_s3 + $0x8] sm:$0xff]   ;;  %s449_s26 = sadd.s32 %s2213_s25, %s447_s24  ;;  %p455_p0 = scmp.gt.s32.totalorder %s1704_s21, 0  ;;  %1822 = vmatpush3.bf16.msra.mxu0 %v1939_v14  ;;  %v2293_v31 = vrot.slane %v948_v24, %v1045_v23  ;;  %v2295_v32 = vrot.slane %v949_v25, %v1045_v23  ;;  %v2301_v34 = vrot.slane %v948_v24, %v953_v26  ;;  %v2303_v35 = vrot.slane %v950_v28, %v1045_v23 }
  0x24   : > { %1783 = vmatprep.subr.bf16.mxu1 %v1926_v0  ;;  %s1702_s28 = sshll.u32 %s449_s26, 2  ;;  %s472_s24 = sadd.s32 8, %s1703_s18  ;;  %1823 = vmatprep.subr.bf16.mxu0 %v1940_v15  ;;  %v2305_v37 = vrot.slane %v949_v25, %v953_v26  ;;  %v2310_v40 = vrot.slane %v948_v24, %v1153_v29  ;;  %v2312_v41 = vrot.slane %v950_v28, %v953_v26 }
  0x25   : > { %1784 = vmatpush3.bf16.msra.mxu1 %v1926_v0  ;;  %s2219_s19 = scalar_lea.vmem %s3084_s0, %s1702_s28  ;;  %s3172_s21 = smov (!%p455_p0, %s1704_s21), 0  ;;  %v2315_v44 = vrot.slane %v949_v25, %v1153_v29  ;;  %v2317_v45 = vrot.slane %v950_v28, %v1153_v29 }
  0x26   : > { %1785 = vmatprep.subr.bf16.mxu1 %v1927_v1  ;;  %v1928_v3 = vld [vmem:[%s2219_s19] sm:$0xff]   ;;  %v1929_v4 = vld [vmem:[%s2219_s19 + $0x8] sm:$0xff]   ;;  %v1930_v5 = vld [vmem:[%s2219_s19 + $0x10] sm:$0xff]   ;;  %p473_p1 = scmp.lt.s32.totalorder %s472_s24, 15  ;;  %s1705_s20 = sshll.u32 %s3172_s21, 1 }
  0x27   : > { %1787 = vmatprep.mubr.msk.bf16.mxu1 %vm570_vm0, %v1928_v3  ;;  %p460_p2 = scmp.lt.s32.totalorder %s1705_s20, 31  ;;  %v1931_v6 = vld [vmem:[%s2219_s19 + $0x18] sm:$0xff]   ;;  %v1932_v7 = vld [vmem:[%s2219_s19 + $0x20] sm:$0xff]   ;;  %v1933_v8 = vld [vmem:[%s2219_s19 + $0x28] sm:$0xff]   ;;  %1824 = vmatpush3.bf16.msra.mxu0 %v1940_v15  ;;  %p794_p5 = scmp.gt.s32.totalorder %s2056_s12, 0 }
  0x28   : > { %s3174_s24 = smov (!%p473_p1, %s472_s24), 15  ;;  %v1934_v9 = vld [vmem:[%s2219_s19 + $0x30] sm:$0xff]   ;;  %v1935_v10 = vld [vmem:[%s2219_s19 + $0x38] sm:$0xff]   ;;  %1825 = vmatprep.subr.bf16.mxu0 %v1941_v16  ;;  %p797_p6 = scmp.lt.s32.totalorder %s2056_s12, 1 }
  0x29   : > { %1786 = vmatpush3.bf16.msra.mxu1 %v1927_v1  ;;  %s3176_s20 = smov (!%p460_p2, %s1705_s20), 31  ;;  %s1709_s26 = sshll.u32 %s3174_s24, 1 }
  0x2a   : > { %1803 = vmatprep.subr.bf16.mxu1 %v2074_v2  ;;  %s463_s28 = sadd.s32 %s2213_s25, %s3176_s20  ;;  %p478_p4 = scmp.lt.s32.totalorder %s1709_s26, 31 }
  0x2b   : > { %s1707_s29 = sshll.u32 %s463_s28, 2  ;;  %1826 = vmatpush3.bf16.msra.mxu0 %v1941_v16  ;;  %s440_s14 = sand.u32 1, %s2048_s10  }
  0x2c   : > { %1788 = vmatmul.mubr.msk.bf16.vlgmr.msra.gmra.mrb[0].mxu1 %vm570_vm0, %v1929_v4  ;;  %s465_s0 = scalar_lea.vmem %s3038_s1, %s1707_s29  ;;  %s3178_s26 = smov (!%p478_p4, %s1709_s26), 31  ;;  %1827 = vmatprep.subr.bf16.mxu0 %v1942_v17 }
  0x2d   : > { %1804 = vmatpush3.bf16.msra.mxu1 %v1926_v0  ;;  %1791 = vmatprep.mubr.msk.bf16.mxu1 %vm570_vm0, %v1930_v5  ;;  %s481_s3 = sadd.s32 %s2213_s25, %s3178_s26  ;;  %v1936_v11 = vld [vmem:[%s465_s0] sm:$0xff]   ;;  %s1747_s19 = sshll.u32 %s2060_s13, 5 }
  0x2e   : > { %1805 = vmatprep.subr.bf16.mxu1 %v2074_v2  ;;  %s1711_s15 = sshll.u32 %s481_s3, 2  ;;  %s1567_s20 = sadd.s32 %s1747_s19, %s2204_s17 }
  0x2f   : > { %s483_s24 = scalar_lea.vmem %s3039_s2, %s1711_s15  ;;  %1828 = vmatpush3.bf16.msra.mxu0 %v1942_v17  ;;  %s1748_s26 = sshll.u32 %s1567_s20, 7 }
  0x30   : > { %v1937_v12 = vld [vmem:[%s483_s24] sm:$0xff]   ;;  %1829 = vmatprep.subr.bf16.mxu0 %v1943_v18  ;;  %s2274_s15 = scalar_select %p794_p5, 1, 0 }
  0x31   : > { %1806 = vmatpush3.bf16.msra.mxu1 %v1927_v1  ;;  %s2276_s27 = scalar_select %p797_p6, 1, 0 }
  0x32   : > { %1811 = vmatprep.subr.bf16.mxu1 %v2074_v2  ;;  %s796_s18 = scvt.s32.f32 %s2274_s15  ;;  %s1699_s15 = sshll.u32 %s440_s14, 7 }
  0x33   : > { %1830 = vmatpush3.bf16.msra.mxu0 %v1943_v18  ;;  %s799_s21 = scvt.s32.f32 %s2276_s27  ;;  %s2955_s25 = scalar_lea.vmem [#allocation2], %s1699_s15 }
  0x34   : > { %1792 = vmatmul.mubr.msk.bf16.gmra.mrb[4].mxu1 %vm570_vm0, %v1931_v6  ;;  %1831 = vmatprep.subr.bf16.mxu0 %v1944_v19  ;;  %v2319_v46 = vstv %s796_s18  ;;  %s1570_s13 = sshll.u32 %s2955_s25, 4  ;;  %s2975_s29 = scalar_lea.hbm %s3046_s9, %s1748_s26  ;;  %s2979_s13 = int_to_ptr.vmem [resolvable:$true] %s1570_s13 }
  0x35   : > { %1795 = vmatprep.mubr.msk.bf16.mxu1 %vm570_vm0, %v1932_v7  ;;  %v2327_v50 = vstv %s799_s21  ;;  %s2985_s17 = scalar_lea.sflag [#allocation3], %s440_s14  ;;  %s1978_s18 = scalar_lea.vmem %s2979_s13, 2048 }
  0x36   : > { %p1979_p7 = scmp.ne.s32.totalorder %s2979_s13, %s1978_s18  ;;  %s2076_s21 = smov [#allocation2]  }
  0x37   : > { %1832 = vmatpush3.bf16.msra.mxu0 %v1944_v19  ;;  %s1982_s24 = sshll.u32 %s2076_s21, 4  ;;  %s1983_s24 = int_to_ptr.vmem [resolvable:$false] %s1982_s24 }
  0x38   : > { %1833 = vmatprep.subr.bf16.mxu0 %v1945_v20  ;;  %p1980_p9 = pnand %p1979_p7, %p2180_p3  ;;  %s1984_s3 = scalar_lea.vmem %s1983_s24, 4096 }
  0x39   : > { %p1985_p11 = scmp.lt.s32.totalorder %s2979_s13, %s1983_s24  ;;  %p1986_p12 = scmp.lt.s32.totalorder %s1984_s3, %s1978_s18 }
  0x3a   : > { %p1981_p10 = pneg %p1980_p9 }
  0x3b   : > { %1834 = vmatpush3.bf16.msra.mxu0 %v1945_v20  ;;  %p1987_p13 = por %p1986_p12, %p1985_p11 }
  0x3c   : > { %1796 = vmatmul.mubr.msk.bf16.gmra.mrb[8].mxu1 %vm570_vm0, %v1933_v8 }
  0x3d   : > { %1799 = vmatprep.mubr.msk.bf16.mxu1 %vm570_vm0, %v1934_v9  ;;  %p1988_p0 = pnand %p1987_p13, %p1981_p10 }
  0x44   : > { %1800 = vmatmul.mubr.msk.bf16.gmra.mrb[12].mxu1 %vm570_vm0, %v1935_v10 }
  0x45   : > { %1807 = vmatprep.mubr.msk.bf16.mxu1 %vm2075_vm1, %v2074_v2 }
  0x4c   : > { %1808 = vmatmul.mubr.msk.bf16.vlgmr.msra.gmra.mrb[16].mxu1 %vm570_vm0, %v1936_v11 }
  0x4d   : > { %1812 = vmatpush3.bf16.msra.mxu1 %v1926_v0  ;;  %1815 = vmatprep.mubr.msk.bf16.mxu1 %vm2075_vm1, %v2074_v2 }
  0x4e   : > { %1813 = vmatprep.subr.bf16.mxu1 %v2074_v2 }
  0x51   : > { %1814 = vmatpush3.bf16.msra.mxu1 %v1927_v1 }
  0x54   : > { %1816 = vmatmul.mubr.msk.bf16.vlgmr.msra.gmra.mrb[20].mxu1 %vm570_vm0, %v1937_v12 }
  0xff   : > { %v1789_v30 = vpop.f32.mrb[0].mxu1 }
 0x100   : > { %v2299_v33 = vadd.f32 %v1789_v30, %v2287_v27  ;;  %v629_v36 = vpop.f32.mrb[1].mxu1 }
 0x101   : > { %v2308_v38 = vadd.f32 %v2287_v27, %v629_v36  ;;  %v1790_v39 = vpop.f32.mrb[2].mxu1 }
 0x102   : > { %3085 = vst [vmem:[#allocation10_spill] sm:$0xff] %v2299_v33  ;;  %v833_v42 = vrot.slane %v2299_v33, 7  ;;  %v632_v43 = vpop.f32.mrb[3].mxu1  ;;  %v2324_v48 = vmul.f32 %v2293_v31, %v2299_v33  ;;  %v2332_v52 = vmul.f32 %v2295_v32, %v2299_v33  ;;  %v2335_v53 = vadd.f32 %v1790_v39, %v2287_v27 }
 0x103   : > { %3086 = vst [vmem:[#allocation11_spill] sm:$0xff] %v2308_v38  ;;  %v830_v49 = vrot.slane %v2308_v38, 7  ;;  %v2338_v54 = vadd.f32 %v2287_v27, %v632_v43  ;;  %v2342_v55 = vmul.f32 %v2303_v35, %v2299_v33  ;;  %v2350_v60 = vmul.f32 %v2293_v31, %v2308_v38 }
 0x104   : > { %v879_v51 = vsel %vm826_vm2, 0.0, %v833_v42  ;;  %3087 = vst [vmem:[#allocation12_spill] sm:$0xff] %v2335_v53  ;;  %v2354_v61 = vmul.f32 %v2295_v32, %v2308_v38  ;;  %v834_v62 = vrot.slane %v2335_v53, 7  ;;  %v2372_v9 = vmul.f32 %v2293_v31, %v2335_v53 }
 0x105   : > { %3088 = vst [vmem:[#allocation13_spill] sm:$0xff] %v2342_v55  ;;  %v878_v56 = vsel %vm826_vm2, 0.0, %v830_v49  ;;  %v977_v58 = vmul.f32 %v2305_v37, %v879_v51  ;;  %v959_v63 = vmul.f32 %v2301_v34, %v879_v51  ;;  %v831_v1 = vrot.slane %v2338_v54, 7 }
 0x106   : > { %v957_v59 = vmul.f32 %v2301_v34, %v878_v56  ;;  %v2359_v0 = vmul.f32 %v2305_v37, %v878_v56  ;;  %v2363_v3 = vmul.f32 %v2312_v41, %v879_v51  ;;  %v2366_v5 = vsel %vm826_vm2, %v833_v42, %v834_v62 }
 0x107   : > { %v1793_v2 = vpop.f32.mrb[4].mxu1  ;;  %v3051_v7 = vrot.slane %v2338_v54, 1  ;;  %v2376_v10 = vmul.f32 %v2295_v32, %v2335_v53  ;;  %v832_v11 = vsel %vm826_vm2, %v830_v49, %v831_v1  ;;  %v978_v12 = vmul.f32 %v2305_v37, %v2366_v5 }
 0x108   : > { %v993_v4 = vadd.f32 %v977_v58, %v957_v59  ;;  %v645_v8 = vpop.f32.mrb[5].mxu1  ;;  %v2383_v14 = vmul.f32 %v2303_v35, %v2335_v53  ;;  %v958_v16 = vmul.f32 %v2301_v34, %v832_v11  ;;  %v2390_v17 = vadd.f32 %v1793_v2, %v2287_v27 }
 0x109   : > { %v1794_v13 = vpop.f32.mrb[6].mxu1  ;;  %v939_v15 = vsel %vm887_vm3, %v3051_v7, 0.0  ;;  %v2394_v19 = vmul.f32 %v2301_v34, %v2366_v5  ;;  %v2398_v20 = vmul.f32 %v2293_v31, %v2338_v54  ;;  %v2402_v21 = vmul.f32 %v2295_v32, %v2338_v54 }
 0x10a   : > { %3089 = vst [vmem:[#allocation14_spill] sm:$0xff] %v2383_v14  ;;  %3090 = vst [vmem:[#allocation15_spill] sm:$0xff] %v2390_v17  ;;  %v648_v18 = vpop.f32.mrb[7].mxu1  ;;  %v2405_v22 = vadd.f32 %v2287_v27, %v645_v8  ;;  %v2408_v23 = vmul.f32 %v2305_v37, %v832_v11  ;;  %v2410_v24 = vadd.f32 %v978_v12, %v958_v16  ;;  %v839_v25 = vrot.slane %v2390_v17, 7 }
 0x10b   : > { %3091 = vst [vmem:[#allocation16_spill] sm:$0xff] %v2402_v21  ;;  %v2414_v26 = vadd.f32 %v1794_v13, %v2287_v27  ;;  %v2417_v28 = vmul.f32 %v2310_v40, %v939_v15  ;;  %v2420_v29 = vmul.f32 %v2315_v44, %v939_v15  ;;  %v2427_v42 = vmul.f32 %v2293_v31, %v2390_v17 }
 0x10c   : > { %3092 = vst [vmem:[#allocation17_spill] sm:$0xff] %v2405_v22  ;;  %v836_v36 = vrot.slane %v2405_v22, 7  ;;  %v881_v39 = vsel %vm826_vm2, 0.0, %v839_v25  ;;  %v2431_v43 = vmul.f32 %v2295_v32, %v2390_v17  ;;  %v1123_v49 = vmul.f32 %v2303_v35, %v2390_v17 }
 0x10d   : > { %3093 = vst [vmem:[#allocation18_spill] sm:$0xff] %v2414_v26  ;;  %3094 = vst [vmem:[#allocation19_spill] sm:$0xff] %v2417_v28  ;;  %v981_v51 = vmul.f32 %v2305_v37, %v881_v39  ;;  %v2440_v59 = vmul.f32 %v2293_v31, %v2405_v22  ;;  %v840_v11 = vrot.slane %v2414_v26, 7  ;;  %v1015_v13 = vmul.f32 %v2312_v41, %v881_v39 }
 0x10e   : > { %3095 = vst [vmem:[#allocation20_spill] sm:$0xff] %v2420_v29  ;;  %v880_v56 = vsel %vm826_vm2, 0.0, %v836_v36  ;;  %v1087_v15 = vmul.f32 %v2295_v32, %v2405_v22  ;;  %v1121_v16 = vmul.f32 %v2303_v35, %v2405_v22  ;;  %v3054_v30 = vrot.slane %v2414_v26, 1 }
 0x10f   : > { %v1797_v62 = vpop.f32.mrb[8].mxu1  ;;  %v961_v1 = vmul.f32 %v2301_v34, %v880_v56  ;;  %v979_v2 = vmul.f32 %v2305_v37, %v880_v56  ;;  %v1013_v8 = vmul.f32 %v2312_v41, %v880_v56  ;;  %v841_v56 = vsel %vm826_vm2, %v839_v25, %v840_v11 }
 0x110   : > { %v661_v12 = vpop.f32.mrb[9].mxu1  ;;  %v2456_v17 = vmul.f32 %v2301_v34, %v881_v39  ;;  %v2460_v28 = vmul.f32 %v2293_v31, %v2414_v26  ;;  %v2464_v22 = vmul.f32 %v2295_v32, %v2414_v26  ;;  %v2474_v25 = vsel %vm887_vm3, %v3054_v30, 0.0 }
 0x111   : > { %v1798_v58 = vpop.f32.mrb[10].mxu1  ;;  %v995_v47 = vadd.f32 %v979_v2, %v959_v63  ;;  %v2452_v6 = vadd.f32 %v981_v51, %v961_v1  ;;  %v1029_v57 = vadd.f32 %v1013_v8, %v993_v4  ;;  %v2468_v63 = vmul.f32 %v2303_v35, %v2414_v26  ;;  %3096 = vst [vmem:[#allocation21_spill] sm:$0xff] %v2474_v25 }
 0x112   : > { %v664_v7 = vpop.f32.mrb[11].mxu1  ;;  %v2477_v39 = vadd.f32 %v2287_v27, %v648_v18  ;;  %v2480_v1 = vmul.f32 %v2301_v34, %v841_v56  ;;  %v982_v2 = vmul.f32 %v2305_v37, %v841_v56  ;;  %v1016_v8 = vmul.f32 %v2312_v41, %v841_v56 }
 0x113   : > { %v1031_v51 = vadd.f32 %v1015_v13, %v995_v47  ;;  %v1065_v4 = vadd.f32 %v2350_v60, %v1029_v57  ;;  %v2485_v11 = vadd.f32 %v1797_v62, %v2287_v27  ;;  %v2493_v18 = vmul.f32 %v2310_v40, %v2474_v25 }
 0x114   : > { %3097 = vst [vmem:[#allocation22_spill] sm:$0xff] %v2477_v39  ;;  %v837_v60 = vrot.slane %v2477_v39, 7  ;;  %v2497_v26 = vadd.f32 %v2287_v27, %v661_v12  ;;  %v2500_v62 = vadd.f32 %v1798_v58, %v2287_v27 }
 0x115   : > { %3098 = vst [vmem:[#allocation23_spill] sm:$0xff] %v2485_v11  ;;  %v1067_v47 = vadd.f32 %v2324_v48, %v1031_v51  ;;  %v1101_v57 = vadd.f32 %v2332_v52, %v1065_v4  ;;  %3099 = vst [vmem:[#allocation24_spill] sm:$0xff] %v2493_v18  ;;  %v845_v30 = vrot.slane %v2485_v11, 7  ;;  %v2508_v4 = vadd.f32 %v2287_v27, %v664_v7 }
 0x116   : > { %3100 = vst [vmem:[#allocation25_spill] sm:$0xff] %v2497_v26  ;;  %3101 = vst [vmem:[#allocation26_spill] sm:$0xff] %v2500_v62  ;;  %v838_v51 = vsel %vm826_vm2, %v836_v36, %v837_v60  ;;  %v3104_v18 = vrot.slane %v2477_v39, 1  ;;  %v2526_v7 = vmul.f32 %v2293_v31, %v2477_v39  ;;  %v1088_v36 = vmul.f32 %v2295_v32, %v2477_v39 }
 0x117   : > { %v2502_v56 = vpop.f32.mrb[12].mxu1  ;;  %v1103_v48 = vadd.f32 %v1087_v15, %v1067_v47  ;;  %v2504_v52 = vadd.f32 %v1121_v16, %v1101_v57  ;;  %3103 = vst [vmem:[#allocation28_spill] sm:$0xff] %v2508_v4  ;;  %v962_v58 = vmul.f32 %v2301_v34, %v838_v51  ;;  %v980_v25 = vmul.f32 %v2305_v37, %v838_v51 }
 0x118   : > { %v2510_v13 = vpop.f32.mrb[13].mxu1  ;;  %v2515_v12 = vsel %vm887_vm3, %v3104_v18, 0.0  ;;  %v1014_v15 = vmul.f32 %v2312_v41, %v838_v51  ;;  %v883_v57 = vsel %vm826_vm2, 0.0, %v845_v30  ;;  %v2549_v14 = vmul.f32 %v2293_v31, %v2485_v11 }
 0x119   : > { %3102 = vst [vmem:[#allocation27_spill] sm:$0xff] %v2504_v52  ;;  %3105 = vst [vmem:[#allocation29_spill] sm:$0xff] %v2515_v12  ;;  %v2520_v16 = vpop.f32.mrb[14].mxu1  ;;  %v2522_v47 = vadd.f32 %v1123_v49, %v1103_v48  ;;  %v996_v18 = vadd.f32 %v980_v25, %v2394_v19  ;;  %v2534_v52 = vadd.f32 %v982_v2, %v962_v58  ;;  %v842_v2 = vrot.slane %v2497_v26, 7 }
 0x11a   : > { %v2531_v60 = vpop.f32.mrb[15].mxu1  ;;  %v1030_v51 = vadd.f32 %v1014_v15, %v2410_v24  ;;  %v1122_v49 = vmul.f32 %v2303_v35, %v2477_v39  ;;  %v2541_v48 = vmul.f32 %v2310_v40, %v2515_v12  ;;  %v2545_v29 = vmul.f32 %v2301_v34, %v883_v57 }
 0x11b   : > { %3106 = vst [vmem:[#allocation30_spill] sm:$0xff] %v2522_v47  ;;  %v1032_v19 = vadd.f32 %v1016_v8, %v996_v18  ;;  %v985_v24 = vmul.f32 %v2305_v37, %v883_v57  ;;  %v1019_v58 = vmul.f32 %v2312_v41, %v883_v57  ;;  %v2557_v15 = vmul.f32 %v2295_v32, %v2485_v11 }
 0x11c   : > { %3107 = vst [vmem:[#allocation31_spill] sm:$0xff] %v2541_v48  ;;  %v1066_v25 = vadd.f32 %v2398_v20, %v1030_v51  ;;  %v1127_v47 = vmul.f32 %v2303_v35, %v2485_v11  ;;  %v846_v48 = vrot.slane %v2500_v62, 7  ;;  %v882_v20 = vsel %vm826_vm2, 0.0, %v842_v2 }
 0x11d   : > { %v1068_v12 = vadd.f32 %v2372_v9, %v1032_v19  ;;  %v965_v57 = vmul.f32 %v2301_v34, %v882_v20  ;;  %v983_v39 = vmul.f32 %v2305_v37, %v882_v20  ;;  %v1017_v55 = vmul.f32 %v2312_v41, %v882_v20 }
 0x11e   : > { %v1102_v8 = vadd.f32 %v2376_v10, %v1066_v25  ;;  %v847_v11 = vsel %vm826_vm2, %v845_v30, %v846_v48  ;;  %v2577_v10 = vmul.f32 %v2293_v31, %v2497_v26  ;;  %v1091_v30 = vmul.f32 %v2295_v32, %v2497_v26 }
 0x11f   : > { %v2566_v51 = vpop.f32.mrb[16].mxu1  ;;  %v1104_v53 = vadd.f32 %v1088_v36, %v1068_v12  ;;  %v999_v25 = vadd.f32 %v983_v39, %v2456_v17  ;;  %v1001_v18 = vadd.f32 %v985_v24, %v965_v57  ;;  %v1033_v38 = vadd.f32 %v1017_v55, %v2452_v6 }
 0x120   : > { %v1809_v33 = vpop.f32.mrb[17].mxu1  ;;  %v2572_v21 = vadd.f32 %v1122_v49, %v1102_v8  ;;  %v1125_v36 = vmul.f32 %v2303_v35, %v2497_v26  ;;  %v3108_v49 = vrot.slane %v2500_v62, 1  ;;  %v2596_v17 = vmul.f32 %v2301_v34, %v847_v11 }
 0x121   : > { %v2579_v19 = vpop.f32.mrb[18].mxu1  ;;  %v2586_v12 = vadd.f32 %v2468_v63, %v1104_v53  ;;  %v1035_v39 = vadd.f32 %v1019_v58, %v999_v25  ;;  %v1069_v55 = vadd.f32 %v2440_v59, %v1033_v38  ;;  %v986_v6 = vmul.f32 %v2305_v37, %v847_v11 }
 0x122   : > { %v1810_v33 = vpop.f32.mrb[19].mxu1  ;;  %v2593_v48 = vsel %vm887_vm3, %v3108_v49, 0.0  ;;  %v1020_v24 = vmul.f32 %v2312_v41, %v847_v11  ;;  %v2603_v53 = vmul.f32 %v2293_v31, %v2500_v62  ;;  %v2607_v63 = vmul.f32 %v2295_v32, %v2500_v62 }
 0x123   : > { %3109 = vst [vmem:[#allocation32_spill] sm:$0xff] %v2593_v48  ;;  %v843_v8 = vrot.slane %v2508_v4, 7  ;;  %v3068_v20 = vrot.slane %v2508_v4, 1  ;;  %v1071_v58 = vadd.f32 %v2427_v42, %v1035_v39  ;;  %v1105_v38 = vadd.f32 %v2431_v43, %v1069_v55 }
 0x124   : > { %v1128_v59 = vmul.f32 %v2303_v35, %v2500_v62  ;;  %v686_v11 = vadd.f32 %v2502_v56, %v2287_v27  ;;  %v2619_v57 = vmul.f32 %v2310_v40, %v2593_v48  ;;  %v2624_v33 = vmul.f32 %v2293_v31, %v2508_v4 }
 0x125   : > { %v844_v25 = vsel %vm826_vm2, %v842_v2, %v843_v8  ;;  %v2628_v42 = vadd.f32 %v2287_v27, %v2510_v13  ;;  %v1107_v49 = vadd.f32 %v1091_v30, %v1071_v58  ;;  %v2632_v39 = vadd.f32 %v1125_v36, %v1105_v38 }
 0x126   : > { %3110 = vst [vmem:[#allocation33_spill] sm:$0xff] %v2619_v57  ;;  %v966_v56 = vmul.f32 %v2301_v34, %v844_v25  ;;  %v984_v55 = vmul.f32 %v2305_v37, %v844_v25  ;;  %v2639_v2 = vsel %vm887_vm3, %v3068_v20, 0.0  ;;  %v1018_v8 = vmul.f32 %v2312_v41, %v844_v25 }
 0x127   : > { %v2630_v43 = vpop.f32.mrb[20].mxu1  ;;  %3111 = vst [vmem:[#allocation34_spill] sm:$0xff] %v2632_v39  ;;  %3112 = vst [vmem:[#allocation35_spill] sm:$0xff] %v2639_v2  ;;  %v1092_v13 = vmul.f32 %v2295_v32, %v2508_v4  ;;  %v851_v57 = vrot.slane %v686_v11, 7  ;;  %v2646_v30 = vadd.f32 %v1127_v47, %v1107_v49  ;;  %v848_v62 = vrot.slane %v2628_v42, 7 }
 0x128   : > { %v1817_v9 = vpop.f32.mrb[21].mxu1  ;;  %v1000_v36 = vadd.f32 %v984_v55, %v2480_v1  ;;  %v2649_v58 = vadd.f32 %v986_v6, %v966_v56  ;;  %v1034_v20 = vadd.f32 %v1018_v8, %v2534_v52  ;;  %v689_v39 = vadd.f32 %v2520_v16, %v2287_v27 }
 0x129   : > { %v2644_v48 = vpop.f32.mrb[22].mxu1  ;;  %3113 = vst [vmem:[#allocation36_spill] sm:$0xff] %v2646_v30  ;;  %v1126_v9 = vmul.f32 %v2303_v35, %v2508_v4  ;;  %v885_v25 = vsel %vm826_vm2, 0.0, %v851_v57  ;;  %v2660_v47 = vmul.f32 %v2310_v40, %v2639_v2  ;;  %v912_v1 = vrot.slane %v686_v11, 1 }
 0x12a   : > { %v1818_v38 = vpop.f32.mrb[23].mxu1  ;;  %v1036_v26 = vadd.f32 %v1020_v24, %v1000_v36  ;;  %v2663_v6 = vmul.f32 %v2295_v32, %v686_v11  ;;  %v1070_v49 = vadd.f32 %v2526_v7, %v1034_v20  ;;  %v2667_v52 = vmul.f32 %v2305_v37, %v885_v25 }
 0x12b   : > { %3114 = vst [vmem:[#allocation37_spill] sm:$0xff] %v2660_v47  ;;  %v1131_v56 = vmul.f32 %v2303_v35, %v686_v11  ;;  %v884_v55 = vsel %vm826_vm2, 0.0, %v848_v62  ;;  %v1023_v24 = vmul.f32 %v2312_v41, %v885_v25  ;;  %v852_v7 = vrot.slane %v689_v39, 7 }
 0x12c   : > { %v1072_v16 = vadd.f32 %v2460_v28, %v1036_v26  ;;  %v987_v8 = vmul.f32 %v2305_v37, %v884_v55  ;;  %v1021_v36 = vmul.f32 %v2312_v41, %v884_v55  ;;  %v1106_v38 = vadd.f32 %v2464_v22, %v1070_v49 }
 0x12d   : > { %v913_v20 = vrot.slane %v689_v39, 1  ;;  %v2680_v4 = vmul.f32 %v2293_v31, %v2628_v42  ;;  %v1095_v28 = vmul.f32 %v2295_v32, %v2628_v42  ;;  %v853_v25 = vsel %vm826_vm2, %v851_v57, %v852_v7 }
 0x12e   : > { %v1108_v30 = vadd.f32 %v1092_v13, %v1072_v16  ;;  %v1003_v2 = vadd.f32 %v987_v8, %v2545_v29  ;;  %v1037_v11 = vadd.f32 %v1021_v36, %v1001_v18  ;;  %v2682_v26 = vadd.f32 %v1126_v9, %v1106_v38 }
 0x12f   : > { %v2688_v22 = vsel %vm887_vm3, %v912_v1, %v913_v20  ;;  %v946_v18 = vsel %vm887_vm3, %v913_v20, 0.0  ;;  %v1129_v16 = vmul.f32 %v2303_v35, %v2628_v42  ;;  %v2697_v9 = vmul.f32 %v2305_v37, %v853_v25 }
 0x130   : > { %v2690_v49 = vadd.f32 %v1128_v59, %v1108_v30  ;;  %v1039_v13 = vadd.f32 %v1023_v24, %v1003_v2  ;;  %v1073_v29 = vadd.f32 %v2577_v10, %v1037_v11  ;;  %v2700_v8 = vmul.f32 %v2295_v32, %v689_v39 }
 0x131   : > { %v1132_v57 = vmul.f32 %v2303_v35, %v689_v39  ;;  %v681_v10 = vadd.f32 %v2287_v27, %v2531_v60  ;;  %v737_v2 = vadd.f32 %v2287_v27, %v2566_v51  ;;  %v1024_v30 = vmul.f32 %v2312_v41, %v853_v25 }
 0x132   : > { %v1075_v1 = vadd.f32 %v2549_v14, %v1039_v13  ;;  %v1109_v59 = vadd.f32 %v2557_v15, %v1073_v29  ;;  %v2712_v24 = vmul.f32 %v2315_v44, %v2688_v22  ;;  %v2715_v36 = vmul.f32 %v2315_v44, %v946_v18 }
 0x133   : > { %v740_v14 = vadd.f32 %v2287_v27, %v2579_v19  ;;  %v2722_v60 = vmul.f32 %v2317_v45, %v946_v18  ;;  %v849_v38 = vrot.slane %v681_v10, 7  ;;  %v801_v51 = vmul.f32 %v2319_v46, %v737_v2 }
 0x134   : > { %v1111_v39 = vadd.f32 %v1095_v28, %v1075_v1  ;;  %v2719_v15 = vadd.f32 %v1129_v16, %v1109_v59  ;;  %v1012_v7 = vmul.f32 %v2312_v41, %v2366_v5  ;;  %v788_v20 = vadd.f32 %v2287_v27, %v2630_v43 }
 0x135   : > { %v969_v11 = vmul.f32 %v2301_v34, %v884_v55  ;;  %v850_v19 = vsel %vm826_vm2, %v848_v62, %v849_v38  ;;  %v910_v28 = vrot.slane %v681_v10, 1  ;;  %v802_v13 = vmul.f32 %v2319_v46, %v740_v14 }
 0x136   : > { %v2730_v25 = vadd.f32 %v1131_v56, %v1111_v39  ;;  %v988_v29 = vmul.f32 %v2305_v37, %v850_v19  ;;  %v1022_v18 = vmul.f32 %v2312_v41, %v850_v19  ;;  %v2737_v16 = vmul.f32 %v2293_v31, %v681_v10 }
 0x137   : > { %v827_v5 = vrot.slane %v801_v51, 7  ;;  %v1096_v1 = vmul.f32 %v2295_v32, %v681_v10  ;;  %v888_v43 = vrot.slane %v801_v51, 1  ;;  %v828_v59 = vrot.slane %v802_v13, 7 }
 0x138   : > { %v889_v55 = vrot.slane %v802_v13, 1  ;;  %v1004_v56 = vadd.f32 %v988_v29, %v2596_v17  ;;  %v1038_v62 = vadd.f32 %v1022_v18, %v2649_v58  ;;  %v804_v46 = vmul.f32 %v2327_v50, %v788_v20 }
 0x139   : > { %v877_v2 = vsel %vm826_vm2, 0.0, %v827_v5  ;;  %v1130_v37 = vmul.f32 %v2303_v35, %v681_v10  ;;  %v829_v39 = vsel %vm826_vm2, %v827_v5, %v828_v59  ;;  %v2749_v32 = vsel %vm887_vm3, %v910_v28, 0.0 }
 0x13a   : > { %v955_v14 = vmul.f32 %v2301_v34, %v877_v2  ;;  %v890_v38 = vsel %vm887_vm3, %v888_v43, %v889_v55  ;;  %v1040_v47 = vadd.f32 %v1024_v30, %v1004_v56  ;;  %v1074_v17 = vadd.f32 %v2624_v33, %v1038_v62 }
 0x13b   : > { %v956_v58 = vmul.f32 %v2301_v34, %v829_v39  ;;  %v1047_v20 = vmul.f32 %v2293_v31, %v801_v51  ;;  %v854_v18 = vrot.slane %v804_v46, 7  ;;  %v3115_v10 = vrot.slane %v2628_v42, 1 }
 0x13c   : > { %v991_v29 = vadd.f32 %v2359_v0, %v955_v14  ;;  %v1076_v5 = vadd.f32 %v2603_v53, %v1040_v47  ;;  %v1110_v43 = vadd.f32 %v2607_v63, %v1074_v17  ;;  %v1048_v33 = vmul.f32 %v2293_v31, %v802_v13 }
 0x13d   : > { %v2758_v2 = vsel %vm887_vm3, %v3115_v10, %v910_v28  ;;  %v992_v30 = vadd.f32 %v2408_v23, %v956_v58  ;;  %v938_v0 = vsel %vm887_vm3, %v889_v55, 0.0  ;;  %v886_v51 = vsel %vm826_vm2, 0.0, %v854_v18  ;;  %v3122_v58 = vld [vmem:[#allocation10_spill] sm:$0xff] }
 0x13e   : > { %v1027_v59 = vadd.f32 %v2363_v3, %v991_v29  ;;  %v1005_v56 = vadd.f32 %v2667_v52, %v969_v11  ;;  %v1112_v42 = vadd.f32 %v1096_v1, %v1076_v5  ;;  %v2768_v62 = vadd.f32 %v1130_v37, %v1110_v43  ;;  %v3117_v37 = vld [vmem:[#allocation11_spill] sm:$0xff]  ;;  %v3124_v29 = vld [vmem:[#allocation13_spill] sm:$0xff]  ;;  %v3126_v43 = vld [vmem:[#allocation14_spill] sm:$0xff] }
 0x13f   : > { %v1028_v28 = vadd.f32 %v1012_v7, %v992_v30  ;;  %v1025_v53 = vmul.f32 %v2312_v41, %v886_v51  ;;  %v1155_v63 = vmul.f32 %v2310_v40, %v890_v38  ;;  %v791_v31 = vadd.f32 %v2287_v27, %v2644_v48  ;;  %v3119_v27 = vld [vmem:[#allocation16_spill] sm:$0xff] }
 0x140   : > { %v1063_v47 = vadd.f32 %v1047_v20, %v1027_v59  ;;  %v970_v3 = vmul.f32 %v2301_v34, %v850_v19  ;;  %v2775_v23 = vadd.f32 %v1132_v57, %v1112_v42  ;;  %v915_v55 = vrot.slane %v804_v46, 1  ;;  %v3120_v19 = vld [vmem:[#allocation12_spill] sm:$0xff] }
 0x141   : > { %v1064_v13 = vadd.f32 %v1048_v33, %v1028_v28  ;;  %v1041_v14 = vadd.f32 %v1025_v53, %v1005_v56  ;;  %v805_v11 = vmul.f32 %v2327_v50, %v791_v31  ;;  %v3116_v1 = vrot.slane %v2338_v54, 1 }
 0x142   : > { %v1099_v52 = vadd.f32 %v2354_v61, %v1063_v47  ;;  %v1006_v7 = vadd.f32 %v2697_v9, %v970_v3  ;;  %v3118_v39 = vrot.slane %v3117_v37, 1  ;;  %v1133_v57 = vmul.f32 %v2303_v35, %v804_v46  ;;  %v3128_v37 = vld [vmem:[#allocation22_spill] sm:$0xff] }
 0x143   : > { %v1100_v48 = vadd.f32 %v3119_v27, %v1064_v13  ;;  %v1077_v34 = vadd.f32 %v2680_v4, %v1041_v14  ;;  %v3121_v17 = vrot.slane %v3120_v19, 1  ;;  %v3123_v61 = vrot.slane %v3122_v58, 1  ;;  %v3130_v27 = vld [vmem:[#allocation17_spill] sm:$0xff]  ;;  %v3133_v19 = vld [vmem:[#allocation19_spill] sm:$0xff] }
 0x144   : > { %v893_v38 = vsel %vm887_vm3, %v3118_v39, %v3116_v1  ;;  %v1135_v9 = vadd.f32 %v3124_v29, %v1099_v52  ;;  %v855_v20 = vrot.slane %v805_v11, 7  ;;  %v916_v54 = vrot.slane %v805_v11, 1  ;;  %v3134_v29 = vld [vmem:[#allocation29_spill] sm:$0xff] }
 0x145   : > { %v896_v50 = vsel %vm887_vm3, %v3123_v61, %v3121_v17  ;;  %v3125_v10 = vmov %v3121_v17  ;;  %v1136_v30 = vadd.f32 %v3126_v43, %v1100_v48  ;;  %v1156_v4 = vmul.f32 %v2310_v40, %v938_v0 }
 0x146   : > { %v940_v5 = vsel %vm887_vm3, %v3125_v10, 0.0  ;;  %v1113_v46 = vadd.f32 %v2663_v6, %v1077_v34  ;;  %v1169_v33 = vmul.f32 %v2310_v40, %v2758_v2  ;;  %v856_v59 = vsel %vm826_vm2, %v854_v18, %v855_v20  ;;  %v3132_v34 = vld [vmem:[#allocation27_spill] sm:$0xff] }
 0x147   : > { %v917_v51 = vsel %vm887_vm3, %v915_v55, %v916_v54  ;;  %v1134_v56 = vmul.f32 %v2303_v35, %v805_v11  ;;  %v1157_v42 = vmul.f32 %v2310_v40, %v893_v38  ;;  %v1026_v53 = vmul.f32 %v2312_v41, %v856_v59  ;;  %v3127_v11 = vld [vmem:[#allocation20_spill] sm:$0xff]  ;;  %v3139_v59 = vld [vmem:[#allocation30_spill] sm:$0xff] }
 0x148   : > { %v1149_v28 = vadd.f32 %v1133_v57, %v1113_v46  ;;  %v1159_v47 = vmul.f32 %v2310_v40, %v896_v50  ;;  %v1160_v0 = vmul.f32 %v2310_v40, %v940_v5  ;;  %v1171_v31 = vadd.f32 %v1155_v63, %v1135_v9 }
 0x149   : > { %v1172_v6 = vadd.f32 %v1156_v4, %v1136_v30  ;;  %v1191_v3 = vmul.f32 %v2315_v44, %v893_v38  ;;  %v1193_v13 = vmul.f32 %v2315_v44, %v896_v50  ;;  %v1042_v14 = vadd.f32 %v1026_v53, %v1006_v7  ;;  %v3137_v30 = vld [vmem:[#allocation15_spill] sm:$0xff] }
 0x14a   : > { %v1185_v18 = vadd.f32 %v1169_v33, %v1149_v28  ;;  %v1194_v55 = vmul.f32 %v2315_v44, %v940_v5  ;;  %v1227_v35 = vmul.f32 %v2317_v45, %v896_v50  ;;  %v1228_v41 = vmul.f32 %v2317_v45, %v940_v5  ;;  %v3135_v5 = vld [vmem:[#allocation18_spill] sm:$0xff] }
 0x14b   : > { %v1207_v52 = vadd.f32 %v1191_v3, %v1171_v31  ;;  %v1208_v1 = vadd.f32 %v3127_v11, %v1172_v6  ;;  %v3129_v39 = vrot.slane %v3128_v37, 1  ;;  %v3131_v63 = vrot.slane %v3130_v27, 1 }
 0x14c   : > { %v2821_v38 = vadd.f32 %v2712_v24, %v1185_v18  ;;  %v1078_v7 = vadd.f32 %v2737_v16, %v1042_v14  ;;  %v1173_v57 = vadd.f32 %v1157_v42, %v3132_v34  ;;  %v1174_v17 = vadd.f32 %v3133_v19, %v2572_v21  ;;  %v2834_v24 = vld [vmem:[%s3043_s6] ss:$0 sm:$0xff] }
 0x14d   : > { %v899_v48 = vsel %vm887_vm3, %v3131_v63, %v3129_v39  ;;  %v1243_v58 = vadd.f32 %v1227_v35, %v1207_v52  ;;  %v1244_v61 = vadd.f32 %v1228_v41, %v1208_v1  ;;  %v1230_v9 = vmul.f32 %v2317_v45, %v3134_v29 }
 0x14e   : > { %v1229_v50 = vmul.f32 %v2317_v45, %v899_v48  ;;  %v1114_v20 = vadd.f32 %v2700_v8, %v1078_v7  ;;  %v1209_v16 = vadd.f32 %v1193_v13, %v1173_v57  ;;  %v1210_v10 = vadd.f32 %v1194_v55, %v1174_v17  ;;  %v3141_v7 = vld [vmem:[#allocation28_spill] sm:$0xff]  ;;  %v3143_v57 = vld [vmem:[#allocation25_spill] sm:$0xff] }
 0x14f   : > { %v3136_v43 = vrot.slane %v3135_v5, 1  ;;  %v3138_v21 = vrot.slane %v3137_v30, 1  ;;  %v1266_v46 = vadd.f32 %v2834_v24, %v1243_v58  ;;  %v1267_v33 = vadd.f32 %v2834_v24, %v1244_v61  ;;  %v3145_v58 = vld [vmem:[#allocation31_spill] sm:$0xff] }
 0x150   : > { %v1175_v42 = vadd.f32 %v1159_v47, %v3139_v59  ;;  %v1176_v8 = vadd.f32 %v1160_v0, %v2586_v12  ;;  %v1150_v28 = vadd.f32 %v1134_v56, %v1114_v20  ;;  %v1170_v53 = vmul.f32 %v2310_v40, %v2749_v32  ;;  %v3146_v20 = vld [vmem:[#allocation34_spill] sm:$0xff] }
 0x151   : > { %v902_v4 = vsel %vm887_vm3, %v3138_v21, %v3136_v43  ;;  %v1245_v31 = vadd.f32 %v1229_v50, %v1209_v16  ;;  %v1246_v6 = vadd.f32 %v1230_v9, %v1210_v10  ;;  %v947_v3 = vsel %vm887_vm3, %v916_v54, 0.0  ;;  %v3147_v21 = vld [vmem:[#allocation35_spill] sm:$0xff]  ;;  %v3148_v59 = vld [vmem:[#allocation26_spill] sm:$0xff] }
 0x152   : > { %v1298_v13 = vmul.f32 0.70710677, %v1266_v46  ;;  %v1299_v18 = vmul.f32 0.70710677, %v1267_v33  ;;  %v1195_v14 = vmul.f32 %v2315_v44, %v899_v48  ;;  %v1186_v55 = vadd.f32 %v1170_v53, %v1150_v28 }
 0x153   : > { %v2850_v35 = vmul.f32 %v2317_v45, %v917_v51  ;;  %v1268_v47 = vadd.f32 %v2834_v24, %v1245_v31  ;;  %v1269_v12 = vadd.f32 %v2834_v24, %v1246_v6  ;;  %v1196_v56 = vmul.f32 %v2315_v44, %v3134_v29  ;;  %v3140_v51 = vld [vmem:[#allocation21_spill] sm:$0xff]  ;;  %v3152_v6 = vld [vmem:[#allocation24_spill] sm:$0xff] }
 0x154   : > { %1946 = verf.f32 %v1298_v13  ;;  %v1211_v0 = vadd.f32 %v1195_v14, %v1175_v42  ;;  %v1231_v52 = vmul.f32 %v2317_v45, %v902_v4  ;;  %v2858_v54 = vadd.f32 %v2715_v36, %v1186_v55 }
 0x155   : > { %v2861_v11 = vmul.f32 %v2317_v45, %v947_v3  ;;  %1948 = verf.f32 %v1299_v18  ;;  %v1232_v1 = vmul.f32 %v2317_v45, %v3140_v51  ;;  %v1300_v41 = vmul.f32 0.70710677, %v1268_v47 }
 0x156   : > { %v1301_v37 = vmul.f32 0.70710677, %v1269_v12  ;;  %v1212_v39 = vadd.f32 %v1196_v56, %v1176_v8  ;;  %v1247_v27 = vadd.f32 %v1231_v52, %v1211_v0  ;;  %v1282_v63 = vmul.f32 0.5, %v1266_v46  ;;  %v3150_v8 = vld [vmem:[#allocation23_spill] sm:$0xff]  ;;  %v3153_v56 = vld [vmem:[#allocation36_spill] sm:$0xff] }
 0x157   : > { %v3142_v34 = vrot.slane %v3141_v7, 1  ;;  %v3144_v19 = vrot.slane %v3143_v57, 1  ;;  %v1161_v36 = vmul.f32 %v2310_v40, %v899_v48  ;;  %v1178_v61 = vadd.f32 %v3145_v58, %v2682_v26 }
 0x158   : > { %1950 = verf.f32 %v1300_v41  ;;  %v1248_v50 = vadd.f32 %v1232_v1, %v1212_v39  ;;  %v1270_v29 = vadd.f32 %v2834_v24, %v1247_v27  ;;  %v1198_v9 = vmul.f32 %v2315_v44, %v3140_v51 }
 0x159   : > { %v905_v17 = vsel %vm887_vm3, %v3144_v19, %v3142_v34  ;;  %1952 = verf.f32 %v1301_v37  ;;  %v1177_v16 = vadd.f32 %v1161_v36, %v3146_v20  ;;  %v1197_v10 = vmul.f32 %v2315_v44, %v902_v4  ;;  %v3154_v19 = vld [vmem:[#allocation32_spill] sm:$0xff] }
 0x15a   : > { %v1233_v5 = vmul.f32 %v2317_v45, %v905_v17  ;;  %v1271_v43 = vadd.f32 %v2834_v24, %v1248_v50  ;;  %v1302_v48 = vmul.f32 0.70710677, %v1270_v29  ;;  %v1214_v30 = vadd.f32 %v1198_v9, %v1178_v61 }
 0x15b   : > { %v1234_v26 = vmul.f32 %v2317_v45, %v3147_v21  ;;  %v1213_v46 = vadd.f32 %v1197_v10, %v1177_v16  ;;  %v3149_v42 = vrot.slane %v3148_v59, 1  ;;  %v3151_v28 = vrot.slane %v3150_v8, 1 }
 0x15c   : > { %v1163_v31 = vmul.f32 %v2310_v40, %v902_v4  ;;  %v1180_v3 = vadd.f32 %v3152_v6, %v2690_v49  ;;  %v1283_v13 = vmul.f32 0.5, %v1267_v33  ;;  %v1303_v18 = vmul.f32 0.70710677, %v1271_v43 }
 0x15d   : > { %v908_v53 = vsel %vm887_vm3, %v3151_v28, %v3149_v42  ;;  %1954 = verf.f32 %v1302_v48  ;;  %v1250_v14 = vadd.f32 %v1234_v26, %v1214_v30  ;;  %v1249_v55 = vadd.f32 %v1233_v5, %v1213_v46  ;;  %v3155_v26 = vld [vmem:[#allocation37_spill] sm:$0xff] }
 0x15e   : > { %v1179_v0 = vadd.f32 %v1163_v31, %v3153_v56  ;;  %v1199_v52 = vmul.f32 %v2315_v44, %v905_v17  ;;  %v1200_v51 = vmul.f32 %v2315_v44, %v3147_v21  ;;  %v1947_v1 = vpop.eup %1946  ;;  %v1284_v41 = vmul.f32 0.5, %v1268_v47 }
 0x15f   : > { %1956 = verf.f32 %v1303_v18  ;;  %v2895_v4 = vadd.f32 %v2834_v24, %v1250_v14  ;;  %v1235_v49 = vmul.f32 %v2317_v45, %v908_v53  ;;  %v1949_v33 = vpop.eup %1948  ;;  %v1330_v37 = vadd.f32 1.0, %v1947_v1 }
 0x160   : > { %v2899_v39 = vadd.f32 %v2834_v24, %v1249_v55  ;;  %v1215_v27 = vadd.f32 %v1199_v52, %v1179_v0  ;;  %v1216_v7 = vadd.f32 %v1200_v51, %v1180_v3  ;;  %v1331_v34 = vadd.f32 1.0, %v1949_v33 }
 0x161   : > { %v1305_v57 = vmul.f32 0.70710677, %v2895_v4  ;;  %v1236_v36 = vmul.f32 %v2317_v45, %v3154_v19  ;;  %v1165_v47 = vmul.f32 %v2310_v40, %v905_v17  ;;  %v1346_v58 = vmul.f32 %v1330_v37, %v1282_v63 }
 0x162   : > { %v1285_v61 = vmul.f32 0.5, %v1269_v12  ;;  %v1304_v50 = vmul.f32 0.70710677, %v2899_v39  ;;  %v1251_v9 = vadd.f32 %v1235_v49, %v1215_v27  ;;  %v1951_v20 = vpop.eup %1950  ;;  %v1347_v16 = vmul.f32 %v1331_v34, %v1283_v13 }
 0x163   : > { %1958 = verf.f32 %v1305_v57  ;;  %v1252_v10 = vadd.f32 %v1236_v36, %v1216_v7  ;;  %v1181_v5 = vadd.f32 %v1165_v47, %v2719_v15  ;;  %v1953_v48 = vpop.eup %1952  ;;  %v1332_v30 = vadd.f32 1.0, %v1951_v20 }
 0x164   : > { %1960 = verf.f32 %v1304_v50  ;;  %v2908_v21 = vadd.f32 %v2834_v24, %v1251_v9  ;;  %v1182_v17 = vadd.f32 %v3155_v26, %v2768_v62  ;;  %v1362_v63 = vpack.c.bf16 %v1347_v16, %v1346_v58 }
 0x165   : > { %v1333_v12 = vadd.f32 1.0, %v1953_v48  ;;  %v2913_v46 = vadd.f32 %v2834_v24, %v1252_v10  ;;  %v1201_v59 = vmul.f32 %v2315_v44, %v908_v53  ;;  %v1286_v42 = vmul.f32 0.5, %v1270_v29 }
 0x166   : > { %v1287_v8 = vmul.f32 0.5, %v1271_v43  ;;  %v1306_v15 = vmul.f32 0.70710677, %v2908_v21  ;;  %v1202_v28 = vmul.f32 %v2315_v44, %v3154_v19  ;;  %1835 = vmatprep.mubr.bf16.mxu0 %v1362_v63  ;;  %v1348_v6 = vmul.f32 %v1332_v30, %v1284_v41  ;;  %v3156_v41 = vld [vmem:[#allocation33_spill] sm:$0xff] }
 0x167   : > { %v1955_v31 = vpop.eup %1954  ;;  %v1349_v3 = vmul.f32 %v1333_v12, %v1285_v61  ;;  %v1307_v62 = vmul.f32 0.70710677, %v2913_v46  ;;  %v1217_v13 = vadd.f32 %v1201_v59, %v1181_v5  ;;  %v1237_v55 = vmul.f32 %v2317_v45, %v2758_v2 }
 0x168   : > { %v1334_v18 = vadd.f32 1.0, %v1955_v31  ;;  %1962 = verf.f32 %v1306_v15  ;;  %v1218_v14 = vadd.f32 %v1202_v28, %v1182_v17  ;;  %v1238_v56 = vmul.f32 %v2317_v45, %v2749_v32 }
 0x169   : > { %v1957_v29 = vpop.eup %1956  ;;  %v1363_v43 = vpack.c.bf16 %v1349_v3, %v1348_v6  ;;  %1964 = verf.f32 %v1307_v62  ;;  %v1167_v0 = vmul.f32 %v2310_v40, %v908_v53  ;;  %v1253_v1 = vadd.f32 %v1237_v55, %v1217_v13 }
 0x16a   : > { %v1335_v52 = vadd.f32 1.0, %v1957_v29  ;;  %v1350_v51 = vmul.f32 %v1334_v18, %v1286_v42  ;;  %v1184_v49 = vadd.f32 %v3156_v41, %v2775_v23  ;;  %v1254_v33 = vadd.f32 %v1238_v56, %v1218_v14 }
 0x16b   : > { %1836 = vmatmul.mubr.bf16.vlgmr.msra.gmra.mrb[0].mxu0 %v1363_v43  ;;  %v1183_v37 = vadd.f32 %v1167_v0, %v2730_v25  ;;  %v1203_v27 = vmul.f32 %v2315_v44, %v2758_v2  ;;  %v1204_v7 = vmul.f32 %v2315_v44, %v2749_v32  ;;  %v1276_v57 = vadd.f32 %v2834_v24, %v1253_v1 }
 0x16c   : > { %v1351_v34 = vmul.f32 %v1335_v52, %v1287_v8  ;;  %v1239_v40 = vmul.f32 %v2317_v45, %v2688_v22  ;;  %v1257_v53 = vadd.f32 %v2850_v35, %v2821_v38  ;;  %v1277_v19 = vadd.f32 %v2834_v24, %v1254_v33 }
 0x16d   : > { %v1959_v23 = vpop.eup %1958  ;;  %v1219_v36 = vadd.f32 %v1203_v27, %v1183_v37  ;;  %v1220_v25 = vadd.f32 %v1204_v7, %v1184_v49  ;;  %v1258_v2 = vadd.f32 %v2861_v11, %v2858_v54  ;;  %v1289_v44 = vmul.f32 0.5, %v2895_v4 }
 0x16e   : > { %v1961_v47 = vpop.eup %1960  ;;  %v1364_v58 = vpack.c.bf16 %v1351_v34, %v1350_v51  ;;  %v1337_v32 = vadd.f32 1.0, %v1959_v23  ;;  %v1308_v61 = vmul.f32 0.70710677, %v1276_v57  ;;  %v1288_v50 = vmul.f32 0.5, %v2899_v39 }
 0x16f   : > { %v1336_v45 = vadd.f32 1.0, %v1961_v47  ;;  %v1309_v22 = vmul.f32 0.70710677, %v1277_v19  ;;  %v1255_v9 = vadd.f32 %v1239_v40, %v1219_v36  ;;  %v1256_v35 = vadd.f32 %v2722_v60, %v1220_v25  ;;  %v1736_v40 = vld [vmem:[%s3045_s8] ss:$0 sm:$0xff] }
 0x170   : > { %1839 = vmatprep.mubr.bf16.mxu0 %v1364_v58  ;;  %v1353_v38 = vmul.f32 %v1337_v32, %v1289_v44  ;;  %1966 = verf.f32 %v1308_v61  ;;  %v1280_v20 = vadd.f32 %v2834_v24, %v1257_v53  ;;  %v1281_v11 = vadd.f32 %v2834_v24, %v1258_v2 }
 0x171   : > { %v1352_v16 = vmul.f32 %v1336_v45, %v1288_v50  ;;  %1968 = verf.f32 %v1309_v22  ;;  %v1278_v54 = vadd.f32 %v2834_v24, %v1255_v9  ;;  %v1279_v10 = vadd.f32 %v2834_v24, %v1256_v35 }
 0x172   : > { %v1963_v4 = vpop.eup %1962  ;;  %v1312_v26 = vmul.f32 0.70710677, %v1280_v20  ;;  %v1290_v17 = vmul.f32 0.5, %v2908_v21  ;;  %v1291_v60 = vmul.f32 0.5, %v2913_v46  ;;  %v1313_v59 = vmul.f32 0.70710677, %v1281_v11 }
 0x173   : > { %v1965_v39 = vpop.eup %1964  ;;  %v1365_v5 = vpack.c.bf16 %v1353_v38, %v1352_v16  ;;  %v1338_v48 = vadd.f32 1.0, %v1963_v4  ;;  %v1310_v30 = vmul.f32 0.70710677, %v1278_v54  ;;  %v1311_v12 = vmul.f32 0.70710677, %v1279_v10 }
 0x174   : > { %v1339_v63 = vadd.f32 1.0, %v1965_v39  ;;  %v1292_v6 = vmul.f32 0.5, %v1276_v57  ;;  %v1293_v3 = vmul.f32 0.5, %v1277_v19  ;;  %v1294_v43 = vmul.f32 0.5, %v1278_v54 }
 0x175   : > { %1840 = vmatmul.mubr.bf16.gmra.mrb[4].mxu0 %v1365_v5  ;;  %1970 = verf.f32 %v1310_v30  ;;  %v1354_v42 = vmul.f32 %v1338_v48, %v1290_v17  ;;  %v1295_v56 = vmul.f32 0.5, %v1279_v10  ;;  %v1296_v51 = vmul.f32 0.5, %v1280_v20 }
 0x176   : > { %v1355_v8 = vmul.f32 %v1339_v63, %v1291_v60  ;;  %1972 = verf.f32 %v1311_v12  ;;  %v1297_v33 = vmul.f32 0.5, %v1281_v11 }
 0x177   : > { %1974 = verf.f32 %v1312_v26 }
 0x178   : > { %v1366_v15 = vpack.c.bf16 %v1355_v8, %v1354_v42  ;;  %1976 = verf.f32 %v1313_v59 }
 0x17a   : > { %v1967_v24 = vpop.eup %1966  ;;  %1843 = vmatprep.mubr.bf16.mxu0 %v1366_v15 }
 0x17b   : > { %v1969_v28 = vpop.eup %1968  ;;  %v1340_v31 = vadd.f32 1.0, %v1967_v24 }
 0x17c   : > { %v1341_v21 = vadd.f32 1.0, %v1969_v28 }
 0x17d   : > { %v1356_v62 = vmul.f32 %v1340_v31, %v1292_v6 }
 0x17e   : > { %v1357_v46 = vmul.f32 %v1341_v21, %v1293_v3 }
 0x17f   : > { %v1971_v13 = vpop.eup %1970 }
 0x180   : > { %v1973_v18 = vpop.eup %1972  ;;  %v1367_v14 = vpack.c.bf16 %v1357_v46, %v1356_v62  ;;  %v1342_v55 = vadd.f32 1.0, %v1971_v13 }
 0x181   : > { %v1975_v29 = vpop.eup %1974  ;;  %v1343_v0 = vadd.f32 1.0, %v1973_v18 }
 0x182   : > { %v1977_v52 = vpop.eup %1976  ;;  %1844 = vmatmul.mubr.bf16.gmra.mrb[8].mxu0 %v1367_v14  ;;  %v1344_v1 = vadd.f32 1.0, %v1975_v29  ;;  %v1358_v41 = vmul.f32 %v1342_v55, %v1294_v43 }
 0x183   : > { %v1359_v49 = vmul.f32 %v1343_v0, %v1295_v56  ;;  %v1345_v37 = vadd.f32 1.0, %v1977_v52 }
 0x184   : > { %v1360_v7 = vmul.f32 %v1344_v1, %v1296_v51 }
 0x185   : > { %v1368_v27 = vpack.c.bf16 %v1359_v49, %v1358_v41  ;;  %v1361_v34 = vmul.f32 %v1345_v37, %v1297_v33 }
 0x187   : > { %1847 = vmatprep.mubr.bf16.mxu0 %v1368_v27  ;;  %v1369_v57 = vpack.c.bf16 %v1361_v34, %v1360_v7 }
 0x18a   : > { %1848 = vmatmul.mubr.bf16.gmra.mrb[12].mxu0 %v1369_v57 }
 0x23e   : > { %v1837_v53 = vpop.f32.mrb[0].mxu0 }
 0x23f   : > { %v1484_v23 = vadd.f32 %v1837_v53, %v1736_v40  ;;  %v1475_v19 = vpop.f32.mrb[1].mxu0 }
 0x240   : > { %v1476_v36 = vadd.f32 %v1736_v40, %v1475_v19  ;;  %v1838_v25 = vpop.f32.mrb[2].mxu0 }
 0x241   : > { %1540 = vst [vmem:[%s2955_s25 + $0x10] sm:$0xff] %v1484_v23  ;;  %v1487_v2 = vadd.f32 %v1838_v25, %v1736_v40  ;;  %v1478_v47 = vpop.f32.mrb[3].mxu0 }
 0x242   : > { %1538 = vst [vmem:[%s2955_s25] sm:$0xff] %v1476_v36  ;;  %v1479_v58 = vadd.f32 %v1736_v40, %v1478_v47 }
 0x243   : > { %1541 = vst [vmem:[%s2955_s25 + $0x18] sm:$0xff] %v1487_v2 }
 0x244   : > { %1539 = vst [vmem:[%s2955_s25 + $0x8] sm:$0xff] %v1479_v58 }
 0x248   : > { %v1841_v44 = vpop.f32.mrb[4].mxu0 }
 0x249   : > { %v1500_v32 = vadd.f32 %v1841_v44, %v1736_v40  ;;  %v1491_v61 = vpop.f32.mrb[5].mxu0 }
 0x24a   : > { %v1492_v50 = vadd.f32 %v1736_v40, %v1491_v61  ;;  %v1842_v45 = vpop.f32.mrb[6].mxu0 }
 0x24b   : > { %1544 = vst [vmem:[%s2955_s25 + $0x30] sm:$0xff] %v1500_v32  ;;  %v1503_v22 = vadd.f32 %v1842_v45, %v1736_v40  ;;  %v1494_v9 = vpop.f32.mrb[7].mxu0 }
 0x24c   : > { %1542 = vst [vmem:[%s2955_s25 + $0x20] sm:$0xff] %v1492_v50  ;;  %v1495_v38 = vadd.f32 %v1736_v40, %v1494_v9 }
 0x24d   : > { %1545 = vst [vmem:[%s2955_s25 + $0x38] sm:$0xff] %v1503_v22 }
 0x24e   : > { %1543 = vst [vmem:[%s2955_s25 + $0x28] sm:$0xff] %v1495_v38 }
 0x255   : > { %v1845_v35 = vpop.f32.mrb[8].mxu0 }
 0x256   : > { %v1516_v20 = vadd.f32 %v1845_v35, %v1736_v40  ;;  %v1507_v16 = vpop.f32.mrb[9].mxu0 }
 0x257   : > { %v1508_v54 = vadd.f32 %v1736_v40, %v1507_v16  ;;  %v1846_v11 = vpop.f32.mrb[10].mxu0 }
 0x258   : > { %1548 = vst [vmem:[%s2955_s25 + $0x50] sm:$0xff] %v1516_v20  ;;  %v1519_v4 = vadd.f32 %v1846_v11, %v1736_v40  ;;  %v1510_v10 = vpop.f32.mrb[11].mxu0 }
 0x259   : > { %1546 = vst [vmem:[%s2955_s25 + $0x40] sm:$0xff] %v1508_v54  ;;  %v1511_v39 = vadd.f32 %v1736_v40, %v1510_v10 }
 0x25a   : > { %1549 = vst [vmem:[%s2955_s25 + $0x58] sm:$0xff] %v1519_v4 }
 0x25b   : > { %1547 = vst [vmem:[%s2955_s25 + $0x48] sm:$0xff] %v1511_v39 }
 0x25d   : > { %v1849_v5 = vpop.f32.mrb[12].mxu0 }
 0x25e   : > { %v1532_v48 = vadd.f32 %v1849_v5, %v1736_v40  ;;  %v1523_v30 = vpop.f32.mrb[13].mxu0 }
 0x25f   : > { %v1524_v26 = vadd.f32 %v1736_v40, %v1523_v30  ;;  %v1850_v17 = vpop.f32.mrb[14].mxu0 }
 0x260   : > { %1552 = vst [vmem:[%s2955_s25 + $0x70] sm:$0xff] %v1532_v48  ;;  %v1535_v60 = vadd.f32 %v1850_v17, %v1736_v40  ;;  %v1526_v63 = vpop.f32.mrb[15].mxu0 }
 0x261   : > { %1550 = vst [vmem:[%s2955_s25 + $0x60] sm:$0xff] %v1524_v26  ;;  %v1527_v12 = vadd.f32 %v1736_v40, %v1526_v63 }
 0x262   : > { %1553 = vst [vmem:[%s2955_s25 + $0x78] sm:$0xff] %v1535_v60 }
 0x263   : > { %1551 = vst [vmem:[%s2955_s25 + $0x68] sm:$0xff] %v1527_v12 }
 0x264   : > { %1991 = shalt.err (!%p1988_p0)
}
 0x265   : > { %s1992_s14 = scalar_lea.hbm %s2975_s29, 2048  ;;  %s1996_s0 = scalar_lea.hbm %s3046_s9, 8192 }
 0x266   : > { %p1993_p1 = scmp.ne.s32.totalorder %s2975_s29, %s1992_s14  ;;  %p1997_p5 = scmp.lt.u32.totalorder %s2975_s29, %s3046_s9 }
 0x267   : > { %p1998_p6 = scmp.lt.u32.totalorder %s1996_s0, %s1992_s14  ;;  %p2000_p9 = scmp.lt.u32.totalorder %s1992_s14, %s2975_s29 }
 0x268   : > { %p1994_p2 = pnand %p1993_p1, %p2180_p3 }
 0x269   : > { %p1999_p7 = por %p1998_p6, %p1997_p5 }
 0x26a   : > { %p1995_p4 = pneg %p1994_p2 }
 0x26b   : > { %p2001_p10 = por %p2000_p9, %p1999_p7 }
 0x26d   : > { %p2002_p11 = pnand %p2001_p10, %p1995_p4 }
 0x26f   : > { %2005 = shalt.err (!%p2002_p11)
}
 0x270   : > { %s2077_s20 = smov 128   ;;  %s2078_s26 = smov 8  }
 0x271   : > { %1851 = dma.vmem_to_hbm [thread:$0]  (%p2180_p3), %s2979_s13, 2048, %s2975_s29, %s2985_s17, %s2077_s20, %s2077_s20, %s2078_s26  }
 0x272 PF: > { %p1857_p12 = scmp.ge.s32.totalorder %s2072_s16, 2  ;;  %s1585_s28 = sand.u32 1, %s2044_s30  }
 0x273   : > { %s1586_s12 = scalar_lea.sflag [#allocation3], %s1585_s28 }
 0x274   : > { %p1854_p13 = pnand %p1857_p12, %p2189_p8 }
 0x276   : > { %2039 = dma.done.wait (!%p1854_p13), %s1586_s12, 2048  }
 0x277   : > { %2041 = vsyncadd (!%p1854_p13), %s1586_s12, 4294965248  ;;  %s22_s16 = sadd.s32 1, %s2072_s16   ;;  %s3157_s18 = sld [smem:[#allocation9_spill]] }
 0x278   : > { %p19_p0 = scmp.ge.s32.totalorder %s22_s16, 6   ;;  %s3158_s12 = sld [smem:[#allocation5_spill]] }
 0x279   : > { %s3159_s13 = sld [smem:[#allocation6_spill]]  ;;  %s3160_s14 = sld [smem:[#allocation7_spill]] }
 0x27a   : > { %s3161_s15 = sld [smem:[#allocation8_spill]]  ;;  %s3162_s30 = smov %s2048_s10 }
 0x27b   : > { %s3163_s10 = smov %s2052_s11  ;;  %21 = sbr.rel (!%p19_p0) target bundleno = 8 (0x8), region = 97 }
 0x27d   : > { %s3164_s11 = smov %s3157_s18 }
 0x282   :  { %1591 = vsyncpa [#allocation3], 1 }
 0x283   :  { %1593 = vsyncpa [#allocation3 + $0x1], 1 }

</bundles_post_ra>
